<compile_context>
chip_gen: v7x
topology: tpu7x:2x2x1
jax: 0.10.0
libtpu: 0.0.40
codegen_flags: <defaults>
</compile_context>

<pallas_src>
import functools
import math

import numpy as np
import jax
import jax.numpy as jnp
from jax.experimental import pallas as pl
from jax.experimental.pallas import tpu as pltpu


# ----------------------------------------------------------------------------
# sinusoid position table (identical formula to the PyTorch helper)
# ----------------------------------------------------------------------------
def get_sinusoid_encoding_table(n_position, d_hid):
    def cal_angle(position, hid_idx):
        return position / np.power(10000, 2 * (hid_idx // 2) / d_hid)

    table = np.array(
        [[cal_angle(pos, j) for j in range(d_hid)] for pos in range(n_position)],
        dtype=np.float64,
    )
    table[:, 0::2] = np.sin(table[:, 0::2])
    table[:, 1::2] = np.cos(table[:, 1::2])
    return jnp.asarray(table, dtype=jnp.float32)


def _layer_norm(x, gamma, beta, eps=1e-5):
    mu = jnp.mean(x, axis=-1, keepdims=True)
    var = jnp.mean((x - mu) ** 2, axis=-1, keepdims=True)
    return (x - mu) * jax.lax.rsqrt(var + eps) * gamma + beta


# ----------------------------------------------------------------------------
# Pallas kernel: the whole decoder stack.  grid = (B // Bt, n_layers)
# ----------------------------------------------------------------------------
def decoder_stack_kernel(x_ref, mrow_ref, mcol_ref,
                         wqkv_ref, bqkv_ref, wo_ref, bo_ref, ln1g_ref, ln1b_ref,
                         w1_ref, b1_ref, w2_ref, b2_ref, ln2g_ref, ln2b_ref,
                         out_ref, attn_ref, pad_ref,
                         *, n_head, d_k, ksize, mm_dtype):
    layer = pl.program_id(1)
    Bt, L, D = out_ref.shape
    M = Bt * L
    pad = (ksize - 1) // 2
    d_inner = b1_ref.shape[-1]

    # Layer 0 (per batch block): seed the resident activation block and zero the
    # conv halo rows (they are never overwritten afterwards).
    @pl.when(layer == 0)
    def _init():
        out_ref[...] = x_ref[...]
        if pad > 0:
            pad_ref[:, 0:pad, :] = jnp.zeros((Bt, pad, D), jnp.float32)
            pad_ref[:, pad + L:pad + L + pad, :] = jnp.zeros((Bt, pad, D), jnp.float32)

    x = out_ref[...].reshape(M, D)            # (Bt*L, D) f32 carried activation
    mrow = mrow_ref[...]                      # (Bt, 1, L)   1.0 == padded key
    mcol = mcol_ref[...].reshape(M, 1)        # (Bt*L, 1)    1.0 == padded token

    # ---------------- multi-head self attention ----------------
    # Fused QKV projection: one MXU pass with M = Bt*L rows, N = 3D.
    qkv = jnp.dot(x.astype(mm_dtype), wqkv_ref[0],
                  preferred_element_type=jnp.float32) + bqkv_ref[0]       # (M, 3D)
    q, k, v = qkv[:, :D], qkv[:, D:2 * D], qkv[:, 2 * D:]

    scale = 1.0 / math.sqrt(d_k)
    for h in range(n_head):                       # n_head is small & static
        lo = h * d_k
        qh = q[:, lo:lo + d_k].reshape(Bt, L, d_k).astype(mm_dtype)
        kh = k[:, lo:lo + d_k].reshape(Bt, L, d_k).astype(mm_dtype)
        vh = v[:, lo:lo + d_k].reshape(Bt, L, d_k).astype(mm_dtype)
        s = jnp.einsum("bqd,bkd->bqk", qh, kh,
                       preferred_element_type=jnp.float32) * scale        # (Bt, L, L)
        s = jnp.where(mrow > 0.5, -1e30, s)       # finite mask -> no NaN rows
        s = s - jnp.max(s, axis=-1, keepdims=True)
        e = jnp.exp(s)
        p = e * pl.reciprocal(jnp.sum(e, axis=-1, keepdims=True), approx=True)
        pv = jnp.einsum("bqk,bkd->bqd", p.astype(mm_dtype), vh,
                        preferred_element_type=jnp.float32)               # (Bt, L, d_k)
        attn_ref[:, lo:lo + d_k] = pv.reshape(M, d_k)

    # Single output projection with contraction K = D (one MXU pass).
    o = jnp.dot(attn_ref[...].astype(mm_dtype), wo_ref[0],
                preferred_element_type=jnp.float32) + bo_ref[0]
    h1 = _layer_norm(o + x, ln1g_ref[0], ln1b_ref[0])
    h1 = jnp.where(mcol > 0.5, 0.0, h1)           # masked_fill(mask, 0)

    # ---------------- position-wise FFN: conv(k) -> relu -> conv(1) ----------
    # Per-tap accumulated matmuls over a halo-padded buffer (no im2col slab).
    pad_ref[:, pad:pad + L, :] = h1.reshape(Bt, L, D)
    acc = jnp.zeros((M, d_inner), jnp.float32)
    for kk in range(ksize):
        tap = pad_ref[:, kk:kk + L, :].reshape(M, D).astype(mm_dtype)
        acc = acc + jnp.dot(tap, w1_ref[0, kk],
                            preferred_element_type=jnp.float32)
    a = jnp.maximum(acc + b1_ref[0], 0.0)
    y = jnp.dot(a.astype(mm_dtype), w2_ref[0],
                preferred_element_type=jnp.float32) + b2_ref[0]

    h2 = _layer_norm(y + h1, ln2g_ref[0], ln2b_ref[0])
    h2 = jnp.where(mcol > 0.5, 0.0, h2)
    out_ref[...] = h2.reshape(Bt, L, D)


# ----------------------------------------------------------------------------
# wrapper: pack / stack weights and launch the fused kernel
# ----------------------------------------------------------------------------
def pack_decoder_params(layer_params, matmul_dtype=jnp.bfloat16):
    """Stack per-layer params; QKV is lane-fused, w1 stays (ksize, D, d_inner)."""
    def stk(key):
        return jnp.stack([p[key] for p in layer_params]).astype(jnp.float32)

    wqkv = jnp.stack([jnp.concatenate([p["wq"], p["wk"], p["wv"]], axis=1)
                      for p in layer_params]).astype(matmul_dtype)        # (nl, D, 3D)
    bqkv = jnp.stack([jnp.concatenate([p["bq"], p["bk"], p["bv"]], axis=1)
                      for p in layer_params]).astype(jnp.float32)         # (nl, 1, 3D)
    wo = jnp.stack([p["wo"] for p in layer_params]).astype(matmul_dtype)  # (nl, D, D)
    w1 = jnp.stack([p["w1"] for p in layer_params]).astype(matmul_dtype)  # (nl, k, D, d_inner)
    w2 = jnp.stack([p["w2"] for p in layer_params]).astype(matmul_dtype)  # (nl, d_inner, D)
    return (wqkv, bqkv, wo, stk("bo"), stk("ln1g"), stk("ln1b"),
            w1, stk("b1"), w2, stk("b2"), stk("ln2g"), stk("ln2b"))


def _vmem_capacity_bytes():
    try:
        info = pltpu.get_tpu_info()
        return int(getattr(info, "vmem_capacity_bytes", 64 * 2 ** 20))
    except Exception:
        return 64 * 2 ** 20     # conservative (v7x per-TensorCore)


def _pick_batch_tile(B, requested=None):
    if requested is not None:
        if B % requested:
            raise ValueError("batch_tile must divide batch")
        return requested
    # largest divisor of B not exceeding 8 (amortizes weight DMA, fills MXU rows)
    return max(d for d in range(1, min(B, 8) + 1) if B % d == 0)


def run_decoder_stack(x, mask_row, mask_col, packed, *, n_head, ksize,
                      batch_tile=None):
    B, L, D = x.shape
    (wqkv, bqkv, wo, bo, ln1g, ln1b, w1, b1, w2, b2, ln2g, ln2b) = packed
    weights = [wqkv, bqkv, wo, bo, ln1g, ln1b, w1, b1, w2, b2, ln2g, ln2b]
    n_layers = wqkv.shape[0]
    d_inner = w1.shape[-1]
    d_k = D // n_head
    pad = (ksize - 1) // 2
    Bt = _pick_batch_tile(B, batch_tile)

    def act_spec(block):
        nd = len(block)
        return pl.BlockSpec(block, lambda b, l, _nd=nd: (b,) + (0,) * (_nd - 1))

    def layer_spec(full_shape):
        nd = len(full_shape)
        return pl.BlockSpec((1,) + tuple(full_shape[1:]),
                            lambda b, l, _nd=nd: (l,) + (0,) * (_nd - 1))

    in_specs = ([act_spec((Bt, L, D)), act_spec((Bt, 1, L)), act_spec((Bt, L, 1))]
                + [layer_spec(w.shape) for w in weights])
    out_spec = act_spec((Bt, L, D))

    # VMEM budget: double-buffered per-layer weight blocks + activation/mask blocks
    # + scratch + live intermediates, clamped to this generation's physical VMEM
    # (v7x: 64 MiB) minus headroom.
    per_layer_weight_bytes = sum(int(np.prod(w.shape[1:])) * w.dtype.itemsize
                                 for w in weights)
    act_block_bytes = 2 * Bt * L * D * 4 + 2 * Bt * L * 4
    scratch_bytes = (Bt * L * D + Bt * (L + 2 * pad) * D) * 4
    interm_bytes = 4 * (Bt * L * 3 * D + 3 * Bt * L * L
                        + 2 * Bt * L * d_inner + 6 * Bt * L * D)
    est = 2 * (per_layer_weight_bytes + act_block_bytes) + scratch_bytes + interm_bytes
    cap = _vmem_capacity_bytes() - 8 * 2 ** 20
    vmem_limit = int(max(16 * 2 ** 20, min(cap, max(32 * 2 ** 20, 2 * est))))

    kernel = functools.partial(decoder_stack_kernel, n_head=n_head, d_k=d_k,
                               ksize=ksize, mm_dtype=wqkv.dtype)
    return pl.pallas_call(
        kernel,
        out_shape=jax.ShapeDtypeStruct((B, L, D), jnp.float32),
        grid=(B // Bt, n_layers),
        in_specs=in_specs,
        out_specs=out_spec,
        scratch_shapes=[pltpu.VMEM((Bt * L, D), jnp.float32),          # head outputs
                        pltpu.VMEM((Bt, L + 2 * pad, D), jnp.float32)],  # conv halo buf
        compiler_params=pltpu.CompilerParams(
            dimension_semantics=("parallel", "arbitrary"),
            vmem_limit_bytes=vmem_limit),
    )(x, mask_row, mask_col, *weights)


# ----------------------------------------------------------------------------
# Decoder.forward (position-encoding glue in plain JAX; FFT stack is one kernel)
# ----------------------------------------------------------------------------
def decoder_forward(enc_seq, mask, layer_params, *, max_seq_len, n_head, ksize,
                    matmul_dtype=jnp.bfloat16, batch_tile=None):
    B, L, D = enc_seq.shape
    if L > max_seq_len:  # eval long-sequence branch
        x = enc_seq + get_sinusoid_encoding_table(L, D)[None, :L, :]
        max_len = L
    else:
        max_len = min(L, max_seq_len)
        pos = get_sinusoid_encoding_table(max_seq_len + 1, D)
        x = enc_seq[:, :max_len, :] + pos[None, :max_len, :]
        mask = mask[:, :max_len]
    mask_f = mask.astype(jnp.float32)
    mask_row = mask_f.reshape(B, 1, max_len)      # key mask (broadcast over queries)
    mask_col = mask_f.reshape(B, max_len, 1)      # token mask (zero padded rows)
    packed = pack_decoder_params(layer_params, matmul_dtype)
    out = run_decoder_stack(x.astype(jnp.float32), mask_row, mask_col, packed,
                            n_head=n_head, ksize=ksize, batch_tile=batch_tile)
    # TODO(synk): flash-style KV tiling of the (L, L) scores is not implemented;
    # very long sequences (L >> 2k) on v7x should tile the score matrix.
    return out, mask


# ----------------------------------------------------------------------------
# Pure-JAX reference for verification
# ----------------------------------------------------------------------------
def decoder_ref(enc_seq, mask, layer_params, *, max_seq_len, n_head, ksize):
    B, L, D = enc_seq.shape
    d_k = D // n_head
    if L > max_seq_len:
        x = enc_seq + get_sinusoid_encoding_table(L, D)[None, :L, :]
        max_len = L
    else:
        max_len = min(L, max_seq_len)
        x = enc_seq[:, :max_len, :] + \
            get_sinusoid_encoding_table(max_seq_len + 1, D)[None, :max_len, :]
        mask = mask[:, :max_len]
    pad = (ksize - 1) // 2
    key_mask = mask[:, None, None, :]
    tok_mask = mask[:, :, None]
    for p in layer_params:
        q = (x @ p["wq"] + p["bq"]).reshape(B, max_len, n_head, d_k).transpose(0, 2, 1, 3)
        k = (x @ p["wk"] + p["bk"]).reshape(B, max_len, n_head, d_k).transpose(0, 2, 1, 3)
        v = (x @ p["wv"] + p["bv"]).reshape(B, max_len, n_head, d_k).transpose(0, 2, 1, 3)
        s = jnp.einsum("bhqd,bhkd->bhqk", q, k) / math.sqrt(d_k)
        s = jnp.where(key_mask > 0.5, -jnp.inf, s)
        s = s - jnp.max(s, axis=-1, keepdims=True)
        e = jnp.exp(s)
        attn = e / jnp.sum(e, axis=-1, keepdims=True)
        o = jnp.einsum("bhqk,bhkd->bhqd", attn, v).transpose(0, 2, 1, 3).reshape(B, max_len, D)
        o = o @ p["wo"] + p["bo"]
        h1 = _layer_norm(o + x, p["ln1g"], p["ln1b"])
        h1 = jnp.where(tok_mask > 0.5, 0.0, h1)
        xp = jnp.pad(h1, ((0, 0), (pad, pad), (0, 0)))
        acc = sum(jnp.einsum("bld,do->blo", xp[:, kk:kk + max_len, :], p["w1"][kk])
                  for kk in range(ksize))
        acc = jnp.maximum(acc + p["b1"], 0.0)
        y = acc @ p["w2"] + p["b2"]
        h2 = _layer_norm(y + h1, p["ln2g"], p["ln2b"])
        x = jnp.where(tok_mask > 0.5, 0.0, h2)
    return x, mask


# ----------------------------------------------------------------------------
if __name__ == "__main__":
    # small, decoder-consistent shapes
    B, L, D = 2, 8, 32                 # batch, seq, decoder_hidden
    n_head, d_inner, ksize = 2, 64, 9  # decoder_head, conv_filter_size, conv_kernel_size[0]
    n_layers, max_seq_len = 2, 32

    key = jax.random.PRNGKey(0)
    key, k_x = jax.random.split(key)
    enc_seq = jax.random.normal(k_x, (B, L, D), dtype=jnp.float32)
    lengths = jnp.array([L, 5])
    mask = (jnp.arange(L)[None, :] >= lengths[:, None]).astype(jnp.float32)  # 1.0 = pad

    layer_params = []
    for _ in range(n_layers):
        key, *ks = jax.random.split(key, 13)
        s = 0.08
        p = {
            "wq": jax.random.normal(ks[0], (D, D)) * s,
            "bq": jax.random.normal(ks[1], (1, D)) * 0.02,
            "wk": jax.random.normal(ks[2], (D, D)) * s,
            "bk": jax.random.normal(ks[3], (1, D)) * 0.02,
            "wv": jax.random.normal(ks[4], (D, D)) * s,
            "bv": jax.random.normal(ks[5], (1, D)) * 0.02,
            "wo": jax.random.normal(ks[6], (D, D)) * s,
            "bo": jax.random.normal(ks[7], (1, D)) * 0.02,
            "ln1g": jnp.ones((1, D)), "ln1b": jnp.zeros((1, D)),
            "w1": jax.random.normal(ks[8], (ksize, D, d_inner)) * s,   # (K, C_in, C_out)
            "b1": jax.random.normal(ks[9], (1, d_inner)) * 0.02,
            "w2": jax.random.normal(ks[10], (d_inner, D)) * s,          # kernel-size-1 conv
            "b2": jax.random.normal(ks[11], (1, D)) * 0.02,
            "ln2g": jnp.ones((1, D)), "ln2b": jnp.zeros((1, D)),
        }
        layer_params.append(jax.tree_util.tree_map(lambda a: a.astype(jnp.float32), p))

    ref, _ = decoder_ref(enc_seq, mask, layer_params,
                         max_seq_len=max_seq_len, n_head=n_head, ksize=ksize)
    ref = np.asarray(jax.block_until_ready(ref))

    # f32 matmul path (semantics of the PyTorch module; tight tolerance)
    out32, out_mask = decoder_forward(enc_seq, mask, layer_params,
                                      max_seq_len=max_seq_len, n_head=n_head,
                                      ksize=ksize, matmul_dtype=jnp.float32)
    out32 = np.asarray(jax.block_until_ready(out32))
    assert np.allclose(out32, ref, atol=5e-3, rtol=5e-3), \
        float(np.max(np.abs(out32 - ref)))

    # bf16 matmul-input path (default; recommended on v5e/v6e/v7x — f32 accumulation,
    # f32 softmax / LayerNorm / residuals)
    outbf, _ = decoder_forward(enc_seq, mask, layer_params,
                               max_seq_len=max_seq_len, n_head=n_head,
                               ksize=ksize)
    outbf = np.asarray(jax.block_until_ready(outbf))
    assert np.allclose(outbf, ref, atol=5e-2, rtol=5e-2), \
        float(np.max(np.abs(outbf - ref)))

    # TODO(synk): dropout layers are inference-mode identities; attention maps
    # (return_attns=True path) are not returned.
    print("KERNEL_OK")
</pallas_src>

<mosaic_0001>
module attributes {stable_mosaic.version = 11 : i64} {
  func.func @decoder_stack_kernel(%arg0: i32, %arg1: i32, %arg2: memref<2x8x32xf32, #tpu.memory_space<vmem>>, %arg3: memref<2x1x8xf32, #tpu.memory_space<vmem>>, %arg4: memref<2x8x1xf32, #tpu.memory_space<vmem>>, %arg5: memref<1x32x96xf32, #tpu.memory_space<vmem>>, %arg6: memref<1x1x96xf32, #tpu.memory_space<vmem>>, %arg7: memref<1x32x32xf32, #tpu.memory_space<vmem>>, %arg8: memref<1x1x32xf32, #tpu.memory_space<vmem>>, %arg9: memref<1x1x32xf32, #tpu.memory_space<vmem>>, %arg10: memref<1x1x32xf32, #tpu.memory_space<vmem>>, %arg11: memref<1x9x32x64xf32, #tpu.memory_space<vmem>>, %arg12: memref<1x1x64xf32, #tpu.memory_space<vmem>>, %arg13: memref<1x64x32xf32, #tpu.memory_space<vmem>>, %arg14: memref<1x1x32xf32, #tpu.memory_space<vmem>>, %arg15: memref<1x1x32xf32, #tpu.memory_space<vmem>>, %arg16: memref<1x1x32xf32, #tpu.memory_space<vmem>>, %arg17: memref<2x8x32xf32, #tpu.memory_space<vmem>>, %arg18: memref<16x32xf32, #tpu.memory_space<vmem>>, %arg19: memref<2x16x32xf32, #tpu.memory_space<vmem>>) attributes {dimension_semantics = [#tpu.dimension_semantics<parallel>, #tpu.dimension_semantics<arbitrary>], iteration_bounds = array<i64: 1, 2>, scalar_prefetch = 0 : i64, scratch_operands = 2 : i64, tpu.core_type = #tpu.core_type<tc>, window_params = [{transform_indices = @transform_0, window_bounds = array<i64: 2, 8, 32>}, {transform_indices = @transform_1, window_bounds = array<i64: 2, 1, 8>}, {transform_indices = @transform_2, window_bounds = array<i64: 2, 8, 1>}, {transform_indices = @transform_3, window_bounds = array<i64: 1, 32, 96>}, {transform_indices = @transform_4, window_bounds = array<i64: 1, 1, 96>}, {transform_indices = @transform_5, window_bounds = array<i64: 1, 32, 32>}, {transform_indices = @transform_6, window_bounds = array<i64: 1, 1, 32>}, {transform_indices = @transform_7, window_bounds = array<i64: 1, 1, 32>}, {transform_indices = @transform_8, window_bounds = array<i64: 1, 1, 32>}, {transform_indices = @transform_9, window_bounds = array<i64: 1, 9, 32, 64>}, {transform_indices = @transform_10, window_bounds = array<i64: 1, 1, 64>}, {transform_indices = @transform_11, window_bounds = array<i64: 1, 64, 32>}, {transform_indices = @transform_12, window_bounds = array<i64: 1, 1, 32>}, {transform_indices = @transform_13, window_bounds = array<i64: 1, 1, 32>}, {transform_indices = @transform_14, window_bounds = array<i64: 1, 1, 32>}, {transform_indices = @transform_15, window_bounds = array<i64: 2, 8, 32>}]} {
    %c0_i32 = arith.constant 0 : i32
    %0 = arith.cmpi eq, %arg1, %c0_i32 : i32
    %1 = arith.extui %0 : i1 to i32
    %c0_i32_0 = arith.constant 0 : i32
    %2 = arith.cmpi ne, %1, %c0_i32_0 : i32
    scf.if %2 {
      %c0_149 = arith.constant 0 : index
      %c0_150 = arith.constant 0 : index
      %c0_151 = arith.constant 0 : index
      %220 = vector.load %arg2[%c0_149, %c0_150, %c0_151] : memref<2x8x32xf32, #tpu.memory_space<vmem>>, vector<2x8x32xf32>
      %c0_152 = arith.constant 0 : index
      %c0_153 = arith.constant 0 : index
      %c0_154 = arith.constant 0 : index
      %221 = vector.load %arg17[%c0_152, %c0_153, %c0_154] : memref<2x8x32xf32, #tpu.memory_space<vmem>>, vector<2x8x32xf32>
      tpu.vector_store %arg17[%c0_152, %c0_153, %c0_154], %220 {strides = array<i32>} : memref<2x8x32xf32, #tpu.memory_space<vmem>>, vector<2x8x32xf32>,
      %cst_155 = arith.constant 0.000000e+00 : f32
      %222 = vector.broadcast %cst_155 : f32 to vector<2x4x32xf32>
      %c0_156 = arith.constant 0 : index
      %c0_157 = arith.constant 0 : index
      %c0_158 = arith.constant 0 : index
      %223 = vector.load %arg19[%c0_156, %c0_157, %c0_158] : memref<2x16x32xf32, #tpu.memory_space<vmem>>, vector<2x4x32xf32>
      tpu.vector_store %arg19[%c0_156, %c0_157, %c0_158], %222 {strides = array<i32>} : memref<2x16x32xf32, #tpu.memory_space<vmem>>, vector<2x4x32xf32>,
      %cst_159 = arith.constant 0.000000e+00 : f32
      %224 = vector.broadcast %cst_159 : f32 to vector<2x4x32xf32>
      %c0_160 = arith.constant 0 : index
      %c12 = arith.constant 12 : index
      %c0_161 = arith.constant 0 : index
      %225 = vector.load %arg19[%c0_160, %c12, %c0_161] : memref<2x16x32xf32, #tpu.memory_space<vmem>>, vector<2x4x32xf32>
      tpu.vector_store %arg19[%c0_160, %c12, %c0_161], %224 {strides = array<i32>} : memref<2x16x32xf32, #tpu.memory_space<vmem>>, vector<2x4x32xf32>,
    } else {
    }
    %c0 = arith.constant 0 : index
    %c0_1 = arith.constant 0 : index
    %c0_2 = arith.constant 0 : index
    %3 = vector.load %arg17[%c0, %c0_1, %c0_2] : memref<2x8x32xf32, #tpu.memory_space<vmem>>, vector<2x8x32xf32>
    %4 = vector.shape_cast %3 : vector<2x8x32xf32> to vector<16x32xf32>
    %c0_3 = arith.constant 0 : index
    %c0_4 = arith.constant 0 : index
    %c0_5 = arith.constant 0 : index
    %5 = vector.load %arg3[%c0_3, %c0_4, %c0_5] : memref<2x1x8xf32, #tpu.memory_space<vmem>>, vector<2x1x8xf32>
    %c0_6 = arith.constant 0 : index
    %c0_7 = arith.constant 0 : index
    %c0_8 = arith.constant 0 : index
    %6 = vector.load %arg4[%c0_6, %c0_7, %c0_8] : memref<2x8x1xf32, #tpu.memory_space<vmem>>, vector<2x8x1xf32>
    %7 = vector.shape_cast %6 : vector<2x8x1xf32> to vector<16x1xf32>
    %c0_9 = arith.constant 0 : index
    %c0_10 = arith.constant 0 : index
    %c0_11 = arith.constant 0 : index
    %8 = vector.load %arg5[%c0_9, %c0_10, %c0_11] : memref<1x32x96xf32, #tpu.memory_space<vmem>>, vector<1x32x96xf32>
    %9 = vector.shape_cast %8 : vector<1x32x96xf32> to vector<32x96xf32>
    %cst = arith.constant dense<0.000000e+00> : vector<16x96xf32>
    %10 = tpu.matmul %4, %9, %cst {dimension_numbers = #tpu.dot_dimension_numbers<[1], [0], [0], [1], [0, 0, 1, 1], [], []>} : vector<16x32xf32>, vector<32x96xf32>, vector<16x96xf32> -> vector<16x96xf32>
    %c0_12 = arith.constant 0 : index
    %c0_13 = arith.constant 0 : index
    %c0_14 = arith.constant 0 : index
    %11 = vector.load %arg6[%c0_12, %c0_13, %c0_14] : memref<1x1x96xf32, #tpu.memory_space<vmem>>, vector<1x1x96xf32>
    %12 = vector.shape_cast %11 : vector<1x1x96xf32> to vector<1x96xf32>
    %13 = vector.broadcast %12 : vector<1x96xf32> to vector<16x96xf32>
    %14 = arith.addf %10, %13 : vector<16x96xf32>
    %15 = vector.extract_strided_slice %14 {offsets = [0, 0], sizes = [16, 32], strides = [1, 1]} : vector<16x96xf32> to vector<16x32xf32>
    %16 = vector.extract_strided_slice %14 {offsets = [0, 32], sizes = [16, 32], strides = [1, 1]} : vector<16x96xf32> to vector<16x32xf32>
    %17 = vector.extract_strided_slice %14 {offsets = [0, 64], sizes = [16, 32], strides = [1, 1]} : vector<16x96xf32> to vector<16x32xf32>
    %18 = vector.extract_strided_slice %15 {offsets = [0, 0], sizes = [16, 16], strides = [1, 1]} : vector<16x32xf32> to vector<16x16xf32>
    %19 = vector.shape_cast %18 : vector<16x16xf32> to vector<2x8x16xf32>
    %20 = vector.extract_strided_slice %16 {offsets = [0, 0], sizes = [16, 16], strides = [1, 1]} : vector<16x32xf32> to vector<16x16xf32>
    %21 = vector.shape_cast %20 : vector<16x16xf32> to vector<2x8x16xf32>
    %22 = vector.extract_strided_slice %17 {offsets = [0, 0], sizes = [16, 16], strides = [1, 1]} : vector<16x32xf32> to vector<16x16xf32>
    %23 = vector.shape_cast %22 : vector<16x16xf32> to vector<2x8x16xf32>
    "tpu.trace_start"() <{level = 10 : i32, message = "bqd,bkd->bqk"}> : () -> ()
    %cst_15 = arith.constant dense<0.000000e+00> : vector<2x8x8xf32>
    %24 = tpu.matmul %19, %21, %cst_15 {dimension_numbers = #tpu.dot_dimension_numbers<[2], [2], [1], [1], [0, 0, 0, 1, 1, 1], [0], [0]>} : vector<2x8x16xf32>, vector<2x8x16xf32>, vector<2x8x8xf32> -> vector<2x8x8xf32>
    "tpu.trace_stop"() : () -> ()
    %cst_16 = arith.constant 2.500000e-01 : f32
    %25 = vector.broadcast %cst_16 : f32 to vector<2x8x8xf32>
    %26 = arith.mulf %24, %25 : vector<2x8x8xf32>
    %cst_17 = arith.constant 5.000000e-01 : f32
    %27 = vector.broadcast %cst_17 : f32 to vector<2x1x8xf32>
    %28 = arith.cmpf ogt, %5, %27 : vector<2x1x8xf32>
    %cst_18 = arith.constant -1.000000e+30 : f32
    %29 = vector.shape_cast %28 : vector<2x1x8xi1> to vector<2x1x8xi1>
    %30 = vector.broadcast %29 : vector<2x1x8xi1> to vector<2x8x8xi1>
    %31 = vector.broadcast %cst_18 : f32 to vector<2x8x8xf32>
    %32 = arith.select %30, %31, %26 : vector<2x8x8xi1>, vector<2x8x8xf32>
    %cst_19 = arith.constant dense<0xFF800000> : vector<2x8xf32>
    %33 = vector.multi_reduction <maximumf>, %32, %cst_19 [2] : vector<2x8x8xf32> to vector<2x8xf32>
    %34 = vector.shape_cast %33 : vector<2x8xf32> to vector<2x8x1xf32>
    %35 = vector.broadcast %34 : vector<2x8x1xf32> to vector<2x8x8xf32>
    %36 = arith.subf %32, %35 : vector<2x8x8xf32>
    %37 = math.exp %36 : vector<2x8x8xf32>
    %cst_20 = arith.constant dense<0.000000e+00> : vector<2x8xf32>
    %38 = vector.multi_reduction <add>, %37, %cst_20 [2] : vector<2x8x8xf32> to vector<2x8xf32>
    %39 = vector.shape_cast %38 : vector<2x8xf32> to vector<2x8x1xf32>
    %40 = tpu.reciprocal %39 {approx = true} : vector<2x8x1xf32> -> vector<2x8x1xf32>
    %41 = vector.broadcast %40 : vector<2x8x1xf32> to vector<2x8x8xf32>
    %42 = arith.mulf %37, %41 : vector<2x8x8xf32>
    "tpu.trace_start"() <{level = 10 : i32, message = "bqk,bkd->bqd"}> : () -> ()
    %cst_21 = arith.constant dense<0.000000e+00> : vector<2x8x16xf32>
    %43 = tpu.matmul %42, %23, %cst_21 {dimension_numbers = #tpu.dot_dimension_numbers<[2], [1], [1], [2], [0, 0, 0, 1, 1, 2], [0], [0]>} : vector<2x8x8xf32>, vector<2x8x16xf32>, vector<2x8x16xf32> -> vector<2x8x16xf32>
    "tpu.trace_stop"() : () -> ()
    %44 = vector.shape_cast %43 : vector<2x8x16xf32> to vector<16x16xf32>
    %c0_22 = arith.constant 0 : index
    %c0_23 = arith.constant 0 : index
    %45 = vector.load %arg18[%c0_22, %c0_23] : memref<16x32xf32, #tpu.memory_space<vmem>>, vector<16x16xf32>
    tpu.vector_store %arg18[%c0_22, %c0_23], %44 {strides = array<i32>} : memref<16x32xf32, #tpu.memory_space<vmem>>, vector<16x16xf32>,
    %46 = vector.extract_strided_slice %15 {offsets = [0, 16], sizes = [16, 16], strides = [1, 1]} : vector<16x32xf32> to vector<16x16xf32>
    %47 = vector.shape_cast %46 : vector<16x16xf32> to vector<2x8x16xf32>
    %48 = vector.extract_strided_slice %16 {offsets = [0, 16], sizes = [16, 16], strides = [1, 1]} : vector<16x32xf32> to vector<16x16xf32>
    %49 = vector.shape_cast %48 : vector<16x16xf32> to vector<2x8x16xf32>
    %50 = vector.extract_strided_slice %17 {offsets = [0, 16], sizes = [16, 16], strides = [1, 1]} : vector<16x32xf32> to vector<16x16xf32>
    %51 = vector.shape_cast %50 : vector<16x16xf32> to vector<2x8x16xf32>
    "tpu.trace_start"() <{level = 10 : i32, message = "bqd,bkd->bqk"}> : () -> ()
    %cst_24 = arith.constant dense<0.000000e+00> : vector<2x8x8xf32>
    %52 = tpu.matmul %47, %49, %cst_24 {dimension_numbers = #tpu.dot_dimension_numbers<[2], [2], [1], [1], [0, 0, 0, 1, 1, 1], [0], [0]>} : vector<2x8x16xf32>, vector<2x8x16xf32>, vector<2x8x8xf32> -> vector<2x8x8xf32>
    "tpu.trace_stop"() : () -> ()
    %cst_25 = arith.constant 2.500000e-01 : f32
    %53 = vector.broadcast %cst_25 : f32 to vector<2x8x8xf32>
    %54 = arith.mulf %52, %53 : vector<2x8x8xf32>
    %cst_26 = arith.constant 5.000000e-01 : f32
    %55 = vector.broadcast %cst_26 : f32 to vector<2x1x8xf32>
    %56 = arith.cmpf ogt, %5, %55 : vector<2x1x8xf32>
    %cst_27 = arith.constant -1.000000e+30 : f32
    %57 = vector.shape_cast %56 : vector<2x1x8xi1> to vector<2x1x8xi1>
    %58 = vector.broadcast %57 : vector<2x1x8xi1> to vector<2x8x8xi1>
    %59 = vector.broadcast %cst_27 : f32 to vector<2x8x8xf32>
    %60 = arith.select %58, %59, %54 : vector<2x8x8xi1>, vector<2x8x8xf32>
    %cst_28 = arith.constant dense<0xFF800000> : vector<2x8xf32>
    %61 = vector.multi_reduction <maximumf>, %60, %cst_28 [2] : vector<2x8x8xf32> to vector<2x8xf32>
    %62 = vector.shape_cast %61 : vector<2x8xf32> to vector<2x8x1xf32>
    %63 = vector.broadcast %62 : vector<2x8x1xf32> to vector<2x8x8xf32>
    %64 = arith.subf %60, %63 : vector<2x8x8xf32>
    %65 = math.exp %64 : vector<2x8x8xf32>
    %cst_29 = arith.constant dense<0.000000e+00> : vector<2x8xf32>
    %66 = vector.multi_reduction <add>, %65, %cst_29 [2] : vector<2x8x8xf32> to vector<2x8xf32>
    %67 = vector.shape_cast %66 : vector<2x8xf32> to vector<2x8x1xf32>
    %68 = tpu.reciprocal %67 {approx = true} : vector<2x8x1xf32> -> vector<2x8x1xf32>
    %69 = vector.broadcast %68 : vector<2x8x1xf32> to vector<2x8x8xf32>
    %70 = arith.mulf %65, %69 : vector<2x8x8xf32>
    "tpu.trace_start"() <{level = 10 : i32, message = "bqk,bkd->bqd"}> : () -> ()
    %cst_30 = arith.constant dense<0.000000e+00> : vector<2x8x16xf32>
    %71 = tpu.matmul %70, %51, %cst_30 {dimension_numbers = #tpu.dot_dimension_numbers<[2], [1], [1], [2], [0, 0, 0, 1, 1, 2], [0], [0]>} : vector<2x8x8xf32>, vector<2x8x16xf32>, vector<2x8x16xf32> -> vector<2x8x16xf32>
    "tpu.trace_stop"() : () -> ()
    %72 = vector.shape_cast %71 : vector<2x8x16xf32> to vector<16x16xf32>
    %c0_31 = arith.constant 0 : index
    %c16 = arith.constant 16 : index
    %73 = vector.load %arg18[%c0_31, %c16] : memref<16x32xf32, #tpu.memory_space<vmem>>, vector<16x16xf32>
    tpu.vector_store %arg18[%c0_31, %c16], %72 {strides = array<i32>} : memref<16x32xf32, #tpu.memory_space<vmem>>, vector<16x16xf32>,
    %c0_32 = arith.constant 0 : index
    %c0_33 = arith.constant 0 : index
    %74 = vector.load %arg18[%c0_32, %c0_33] : memref<16x32xf32, #tpu.memory_space<vmem>>, vector<16x32xf32>
    %c0_34 = arith.constant 0 : index
    %c0_35 = arith.constant 0 : index
    %c0_36 = arith.constant 0 : index
    %75 = vector.load %arg7[%c0_34, %c0_35, %c0_36] : memref<1x32x32xf32, #tpu.memory_space<vmem>>, vector<1x32x32xf32>
    %76 = vector.shape_cast %75 : vector<1x32x32xf32> to vector<32x32xf32>
    %cst_37 = arith.constant dense<0.000000e+00> : vector<16x32xf32>
    %77 = tpu.matmul %74, %76, %cst_37 {dimension_numbers = #tpu.dot_dimension_numbers<[1], [0], [0], [1], [0, 0, 1, 1], [], []>} : vector<16x32xf32>, vector<32x32xf32>, vector<16x32xf32> -> vector<16x32xf32>
    %c0_38 = arith.constant 0 : index
    %c0_39 = arith.constant 0 : index
    %c0_40 = arith.constant 0 : index
    %78 = vector.load %arg8[%c0_38, %c0_39, %c0_40] : memref<1x1x32xf32, #tpu.memory_space<vmem>>, vector<1x1x32xf32>
    %79 = vector.shape_cast %78 : vector<1x1x32xf32> to vector<1x32xf32>
    %80 = vector.broadcast %79 : vector<1x32xf32> to vector<16x32xf32>
    %81 = arith.addf %77, %80 : vector<16x32xf32>
    %82 = arith.addf %81, %4 : vector<16x32xf32>
    %c0_41 = arith.constant 0 : index
    %c0_42 = arith.constant 0 : index
    %c0_43 = arith.constant 0 : index
    %83 = vector.load %arg9[%c0_41, %c0_42, %c0_43] : memref<1x1x32xf32, #tpu.memory_space<vmem>>, vector<1x1x32xf32>
    %84 = vector.shape_cast %83 : vector<1x1x32xf32> to vector<1x32xf32>
    %c0_44 = arith.constant 0 : index
    %c0_45 = arith.constant 0 : index
    %c0_46 = arith.constant 0 : index
    %85 = vector.load %arg10[%c0_44, %c0_45, %c0_46] : memref<1x1x32xf32, #tpu.memory_space<vmem>>, vector<1x1x32xf32>
    %86 = vector.shape_cast %85 : vector<1x1x32xf32> to vector<1x32xf32>
    %cst_47 = arith.constant dense<0.000000e+00> : vector<16xf32>
    %87 = vector.multi_reduction <add>, %82, %cst_47 [1] : vector<16x32xf32> to vector<16xf32>
    %88 = vector.shape_cast %87 : vector<16xf32> to vector<16x1xf32>
    %cst_48 = arith.constant 3.200000e+01 : f32
    %89 = vector.broadcast %cst_48 : f32 to vector<16x1xf32>
    %90 = arith.divf %88, %89 : vector<16x1xf32>
    %91 = vector.broadcast %90 : vector<16x1xf32> to vector<16x32xf32>
    %92 = arith.subf %82, %91 : vector<16x32xf32>
    %93 = arith.mulf %92, %92 : vector<16x32xf32>
    %cst_49 = arith.constant dense<0.000000e+00> : vector<16xf32>
    %94 = vector.multi_reduction <add>, %93, %cst_49 [1] : vector<16x32xf32> to vector<16xf32>
    %95 = vector.shape_cast %94 : vector<16xf32> to vector<16x1xf32>
    %cst_50 = arith.constant 3.200000e+01 : f32
    %96 = vector.broadcast %cst_50 : f32 to vector<16x1xf32>
    %97 = arith.divf %95, %96 : vector<16x1xf32>
    %98 = vector.broadcast %90 : vector<16x1xf32> to vector<16x32xf32>
    %99 = arith.subf %82, %98 : vector<16x32xf32>
    %cst_51 = arith.constant 9.99999974E-6 : f32
    %100 = vector.broadcast %cst_51 : f32 to vector<16x1xf32>
    %101 = arith.addf %97, %100 : vector<16x1xf32>
    %102 = math.rsqrt %101 : vector<16x1xf32>
    %103 = vector.broadcast %102 : vector<16x1xf32> to vector<16x32xf32>
    %104 = arith.mulf %99, %103 : vector<16x32xf32>
    %105 = vector.broadcast %84 : vector<1x32xf32> to vector<16x32xf32>
    %106 = arith.mulf %104, %105 : vector<16x32xf32>
    %107 = vector.broadcast %86 : vector<1x32xf32> to vector<16x32xf32>
    %108 = arith.addf %106, %107 : vector<16x32xf32>
    %cst_52 = arith.constant 5.000000e-01 : f32
    %109 = vector.broadcast %cst_52 : f32 to vector<16x1xf32>
    %110 = arith.cmpf ogt, %7, %109 : vector<16x1xf32>
    %cst_53 = arith.constant 0.000000e+00 : f32
    %111 = vector.shape_cast %110 : vector<16x1xi1> to vector<16x1xi1>
    %112 = vector.broadcast %111 : vector<16x1xi1> to vector<16x32xi1>
    %113 = vector.broadcast %cst_53 : f32 to vector<16x32xf32>
    %114 = arith.select %112, %113, %108 : vector<16x32xi1>, vector<16x32xf32>
    %115 = vector.shape_cast %114 : vector<16x32xf32> to vector<2x8x32xf32>
    %c0_54 = arith.constant 0 : index
    %c4 = arith.constant 4 : index
    %c0_55 = arith.constant 0 : index
    %116 = vector.load %arg19[%c0_54, %c4, %c0_55] : memref<2x16x32xf32, #tpu.memory_space<vmem>>, vector<2x8x32xf32>
    tpu.vector_store %arg19[%c0_54, %c4, %c0_55], %115 {strides = array<i32>} : memref<2x16x32xf32, #tpu.memory_space<vmem>>, vector<2x8x32xf32>,
    %cst_56 = arith.constant 0.000000e+00 : f32
    %117 = vector.broadcast %cst_56 : f32 to vector<16x64xf32>
    %c0_57 = arith.constant 0 : index
    %c0_58 = arith.constant 0 : index
    %c0_59 = arith.constant 0 : index
    %118 = vector.load %arg19[%c0_57, %c0_58, %c0_59] : memref<2x16x32xf32, #tpu.memory_space<vmem>>, vector<2x8x32xf32>
    %119 = vector.shape_cast %118 : vector<2x8x32xf32> to vector<16x32xf32>
    %c0_60 = arith.constant 0 : index
    %c0_61 = arith.constant 0 : index
    %c0_62 = arith.constant 0 : index
    %c0_63 = arith.constant 0 : index
    %120 = vector.load %arg11[%c0_60, %c0_61, %c0_62, %c0_63] : memref<1x9x32x64xf32, #tpu.memory_space<vmem>>, vector<1x1x32x64xf32>
    %121 = vector.shape_cast %120 : vector<1x1x32x64xf32> to vector<32x64xf32>
    %cst_64 = arith.constant dense<0.000000e+00> : vector<16x64xf32>
    %122 = tpu.matmul %119, %121, %cst_64 {dimension_numbers = #tpu.dot_dimension_numbers<[1], [0], [0], [1], [0, 0, 1, 1], [], []>} : vector<16x32xf32>, vector<32x64xf32>, vector<16x64xf32> -> vector<16x64xf32>
    %123 = arith.addf %117, %122 : vector<16x64xf32>
    %c0_65 = arith.constant 0 : index
    %c1 = arith.constant 1 : index
    %c0_66 = arith.constant 0 : index
    %124 = vector.load %arg19[%c0_65, %c1, %c0_66] : memref<2x16x32xf32, #tpu.memory_space<vmem>>, vector<2x8x32xf32>
    %125 = vector.shape_cast %124 : vector<2x8x32xf32> to vector<16x32xf32>
    %c0_67 = arith.constant 0 : index
    %c1_68 = arith.constant 1 : index
    %c0_69 = arith.constant 0 : index
    %c0_70 = arith.constant 0 : index
    %126 = vector.load %arg11[%c0_67, %c1_68, %c0_69, %c0_70] : memref<1x9x32x64xf32, #tpu.memory_space<vmem>>, vector<1x1x32x64xf32>
    %127 = vector.shape_cast %126 : vector<1x1x32x64xf32> to vector<32x64xf32>
    %cst_71 = arith.constant dense<0.000000e+00> : vector<16x64xf32>
    %128 = tpu.matmul %125, %127, %cst_71 {dimension_numbers = #tpu.dot_dimension_numbers<[1], [0], [0], [1], [0, 0, 1, 1], [], []>} : vector<16x32xf32>, vector<32x64xf32>, vector<16x64xf32> -> vector<16x64xf32>
    %129 = arith.addf %123, %128 : vector<16x64xf32>
    %c0_72 = arith.constant 0 : index
    %c2 = arith.constant 2 : index
    %c0_73 = arith.constant 0 : index
    %130 = vector.load %arg19[%c0_72, %c2, %c0_73] : memref<2x16x32xf32, #tpu.memory_space<vmem>>, vector<2x8x32xf32>
    %131 = vector.shape_cast %130 : vector<2x8x32xf32> to vector<16x32xf32>
    %c0_74 = arith.constant 0 : index
    %c2_75 = arith.constant 2 : index
    %c0_76 = arith.constant 0 : index
    %c0_77 = arith.constant 0 : index
    %132 = vector.load %arg11[%c0_74, %c2_75, %c0_76, %c0_77] : memref<1x9x32x64xf32, #tpu.memory_space<vmem>>, vector<1x1x32x64xf32>
    %133 = vector.shape_cast %132 : vector<1x1x32x64xf32> to vector<32x64xf32>
    %cst_78 = arith.constant dense<0.000000e+00> : vector<16x64xf32>
    %134 = tpu.matmul %131, %133, %cst_78 {dimension_numbers = #tpu.dot_dimension_numbers<[1], [0], [0], [1], [0, 0, 1, 1], [], []>} : vector<16x32xf32>, vector<32x64xf32>, vector<16x64xf32> -> vector<16x64xf32>
    %135 = arith.addf %129, %134 : vector<16x64xf32>
    %c0_79 = arith.constant 0 : index
    %c3 = arith.constant 3 : index
    %c0_80 = arith.constant 0 : index
    %136 = vector.load %arg19[%c0_79, %c3, %c0_80] : memref<2x16x32xf32, #tpu.memory_space<vmem>>, vector<2x8x32xf32>
    %137 = vector.shape_cast %136 : vector<2x8x32xf32> to vector<16x32xf32>
    %c0_81 = arith.constant 0 : index
    %c3_82 = arith.constant 3 : index
    %c0_83 = arith.constant 0 : index
    %c0_84 = arith.constant 0 : index
    %138 = vector.load %arg11[%c0_81, %c3_82, %c0_83, %c0_84] : memref<1x9x32x64xf32, #tpu.memory_space<vmem>>, vector<1x1x32x64xf32>
    %139 = vector.shape_cast %138 : vector<1x1x32x64xf32> to vector<32x64xf32>
    %cst_85 = arith.constant dense<0.000000e+00> : vector<16x64xf32>
    %140 = tpu.matmul %137, %139, %cst_85 {dimension_numbers = #tpu.dot_dimension_numbers<[1], [0], [0], [1], [0, 0, 1, 1], [], []>} : vector<16x32xf32>, vector<32x64xf32>, vector<16x64xf32> -> vector<16x64xf32>
    %141 = arith.addf %135, %140 : vector<16x64xf32>
    %c0_86 = arith.constant 0 : index
    %c4_87 = arith.constant 4 : index
    %c0_88 = arith.constant 0 : index
    %142 = vector.load %arg19[%c0_86, %c4_87, %c0_88] : memref<2x16x32xf32, #tpu.memory_space<vmem>>, vector<2x8x32xf32>
    %143 = vector.shape_cast %142 : vector<2x8x32xf32> to vector<16x32xf32>
    %c0_89 = arith.constant 0 : index
    %c4_90 = arith.constant 4 : index
    %c0_91 = arith.constant 0 : index
    %c0_92 = arith.constant 0 : index
    %144 = vector.load %arg11[%c0_89, %c4_90, %c0_91, %c0_92] : memref<1x9x32x64xf32, #tpu.memory_space<vmem>>, vector<1x1x32x64xf32>
    %145 = vector.shape_cast %144 : vector<1x1x32x64xf32> to vector<32x64xf32>
    %cst_93 = arith.constant dense<0.000000e+00> : vector<16x64xf32>
    %146 = tpu.matmul %143, %145, %cst_93 {dimension_numbers = #tpu.dot_dimension_numbers<[1], [0], [0], [1], [0, 0, 1, 1], [], []>} : vector<16x32xf32>, vector<32x64xf32>, vector<16x64xf32> -> vector<16x64xf32>
    %147 = arith.addf %141, %146 : vector<16x64xf32>
    %c0_94 = arith.constant 0 : index
    %c5 = arith.constant 5 : index
    %c0_95 = arith.constant 0 : index
    %148 = vector.load %arg19[%c0_94, %c5, %c0_95] : memref<2x16x32xf32, #tpu.memory_space<vmem>>, vector<2x8x32xf32>
    %149 = vector.shape_cast %148 : vector<2x8x32xf32> to vector<16x32xf32>
    %c0_96 = arith.constant 0 : index
    %c5_97 = arith.constant 5 : index
    %c0_98 = arith.constant 0 : index
    %c0_99 = arith.constant 0 : index
    %150 = vector.load %arg11[%c0_96, %c5_97, %c0_98, %c0_99] : memref<1x9x32x64xf32, #tpu.memory_space<vmem>>, vector<1x1x32x64xf32>
    %151 = vector.shape_cast %150 : vector<1x1x32x64xf32> to vector<32x64xf32>
    %cst_100 = arith.constant dense<0.000000e+00> : vector<16x64xf32>
    %152 = tpu.matmul %149, %151, %cst_100 {dimension_numbers = #tpu.dot_dimension_numbers<[1], [0], [0], [1], [0, 0, 1, 1], [], []>} : vector<16x32xf32>, vector<32x64xf32>, vector<16x64xf32> -> vector<16x64xf32>
    %153 = arith.addf %147, %152 : vector<16x64xf32>
    %c0_101 = arith.constant 0 : index
    %c6 = arith.constant 6 : index
    %c0_102 = arith.constant 0 : index
    %154 = vector.load %arg19[%c0_101, %c6, %c0_102] : memref<2x16x32xf32, #tpu.memory_space<vmem>>, vector<2x8x32xf32>
    %155 = vector.shape_cast %154 : vector<2x8x32xf32> to vector<16x32xf32>
    %c0_103 = arith.constant 0 : index
    %c6_104 = arith.constant 6 : index
    %c0_105 = arith.constant 0 : index
    %c0_106 = arith.constant 0 : index
    %156 = vector.load %arg11[%c0_103, %c6_104, %c0_105, %c0_106] : memref<1x9x32x64xf32, #tpu.memory_space<vmem>>, vector<1x1x32x64xf32>
    %157 = vector.shape_cast %156 : vector<1x1x32x64xf32> to vector<32x64xf32>
    %cst_107 = arith.constant dense<0.000000e+00> : vector<16x64xf32>
    %158 = tpu.matmul %155, %157, %cst_107 {dimension_numbers = #tpu.dot_dimension_numbers<[1], [0], [0], [1], [0, 0, 1, 1], [], []>} : vector<16x32xf32>, vector<32x64xf32>, vector<16x64xf32> -> vector<16x64xf32>
    %159 = arith.addf %153, %158 : vector<16x64xf32>
    %c0_108 = arith.constant 0 : index
    %c7 = arith.constant 7 : index
    %c0_109 = arith.constant 0 : index
    %160 = vector.load %arg19[%c0_108, %c7, %c0_109] : memref<2x16x32xf32, #tpu.memory_space<vmem>>, vector<2x8x32xf32>
    %161 = vector.shape_cast %160 : vector<2x8x32xf32> to vector<16x32xf32>
    %c0_110 = arith.constant 0 : index
    %c7_111 = arith.constant 7 : index
    %c0_112 = arith.constant 0 : index
    %c0_113 = arith.constant 0 : index
    %162 = vector.load %arg11[%c0_110, %c7_111, %c0_112, %c0_113] : memref<1x9x32x64xf32, #tpu.memory_space<vmem>>, vector<1x1x32x64xf32>
    %163 = vector.shape_cast %162 : vector<1x1x32x64xf32> to vector<32x64xf32>
    %cst_114 = arith.constant dense<0.000000e+00> : vector<16x64xf32>
    %164 = tpu.matmul %161, %163, %cst_114 {dimension_numbers = #tpu.dot_dimension_numbers<[1], [0], [0], [1], [0, 0, 1, 1], [], []>} : vector<16x32xf32>, vector<32x64xf32>, vector<16x64xf32> -> vector<16x64xf32>
    %165 = arith.addf %159, %164 : vector<16x64xf32>
    %c0_115 = arith.constant 0 : index
    %c8 = arith.constant 8 : index
    %c0_116 = arith.constant 0 : index
    %166 = vector.load %arg19[%c0_115, %c8, %c0_116] : memref<2x16x32xf32, #tpu.memory_space<vmem>>, vector<2x8x32xf32>
    %167 = vector.shape_cast %166 : vector<2x8x32xf32> to vector<16x32xf32>
    %c0_117 = arith.constant 0 : index
    %c8_118 = arith.constant 8 : index
    %c0_119 = arith.constant 0 : index
    %c0_120 = arith.constant 0 : index
    %168 = vector.load %arg11[%c0_117, %c8_118, %c0_119, %c0_120] : memref<1x9x32x64xf32, #tpu.memory_space<vmem>>, vector<1x1x32x64xf32>
    %169 = vector.shape_cast %168 : vector<1x1x32x64xf32> to vector<32x64xf32>
    %cst_121 = arith.constant dense<0.000000e+00> : vector<16x64xf32>
    %170 = tpu.matmul %167, %169, %cst_121 {dimension_numbers = #tpu.dot_dimension_numbers<[1], [0], [0], [1], [0, 0, 1, 1], [], []>} : vector<16x32xf32>, vector<32x64xf32>, vector<16x64xf32> -> vector<16x64xf32>
    %171 = arith.addf %165, %170 : vector<16x64xf32>
    %c0_122 = arith.constant 0 : index
    %c0_123 = arith.constant 0 : index
    %c0_124 = arith.constant 0 : index
    %172 = vector.load %arg12[%c0_122, %c0_123, %c0_124] : memref<1x1x64xf32, #tpu.memory_space<vmem>>, vector<1x1x64xf32>
    %173 = vector.shape_cast %172 : vector<1x1x64xf32> to vector<1x64xf32>
    %174 = vector.broadcast %173 : vector<1x64xf32> to vector<16x64xf32>
    %175 = arith.addf %171, %174 : vector<16x64xf32>
    %cst_125 = arith.constant 0.000000e+00 : f32
    %176 = vector.broadcast %cst_125 : f32 to vector<16x64xf32>
    %177 = arith.maximumf %175, %176 : vector<16x64xf32>
    %c0_126 = arith.constant 0 : index
    %c0_127 = arith.constant 0 : index
    %c0_128 = arith.constant 0 : index
    %178 = vector.load %arg13[%c0_126, %c0_127, %c0_128] : memref<1x64x32xf32, #tpu.memory_space<vmem>>, vector<1x64x32xf32>
    %179 = vector.shape_cast %178 : vector<1x64x32xf32> to vector<64x32xf32>
    %cst_129 = arith.constant dense<0.000000e+00> : vector<16x32xf32>
    %180 = tpu.matmul %177, %179, %cst_129 {dimension_numbers = #tpu.dot_dimension_numbers<[1], [0], [0], [1], [0, 0, 1, 1], [], []>} : vector<16x64xf32>, vector<64x32xf32>, vector<16x32xf32> -> vector<16x32xf32>
    %c0_130 = arith.constant 0 : index
    %c0_131 = arith.constant 0 : index
    %c0_132 = arith.constant 0 : index
    %181 = vector.load %arg14[%c0_130, %c0_131, %c0_132] : memref<1x1x32xf32, #tpu.memory_space<vmem>>, vector<1x1x32xf32>
    %182 = vector.shape_cast %181 : vector<1x1x32xf32> to vector<1x32xf32>
    %183 = vector.broadcast %182 : vector<1x32xf32> to vector<16x32xf32>
    %184 = arith.addf %180, %183 : vector<16x32xf32>
    %185 = arith.addf %184, %114 : vector<16x32xf32>
    %c0_133 = arith.constant 0 : index
    %c0_134 = arith.constant 0 : index
    %c0_135 = arith.constant 0 : index
    %186 = vector.load %arg15[%c0_133, %c0_134, %c0_135] : memref<1x1x32xf32, #tpu.memory_space<vmem>>, vector<1x1x32xf32>
    %187 = vector.shape_cast %186 : vector<1x1x32xf32> to vector<1x32xf32>
    %c0_136 = arith.constant 0 : index
    %c0_137 = arith.constant 0 : index
    %c0_138 = arith.constant 0 : index
    %188 = vector.load %arg16[%c0_136, %c0_137, %c0_138] : memref<1x1x32xf32, #tpu.memory_space<vmem>>, vector<1x1x32xf32>
    %189 = vector.shape_cast %188 : vector<1x1x32xf32> to vector<1x32xf32>
    %cst_139 = arith.constant dense<0.000000e+00> : vector<16xf32>
    %190 = vector.multi_reduction <add>, %185, %cst_139 [1] : vector<16x32xf32> to vector<16xf32>
    %191 = vector.shape_cast %190 : vector<16xf32> to vector<16x1xf32>
    %cst_140 = arith.constant 3.200000e+01 : f32
    %192 = vector.broadcast %cst_140 : f32 to vector<16x1xf32>
    %193 = arith.divf %191, %192 : vector<16x1xf32>
    %194 = vector.broadcast %193 : vector<16x1xf32> to vector<16x32xf32>
    %195 = arith.subf %185, %194 : vector<16x32xf32>
    %196 = arith.mulf %195, %195 : vector<16x32xf32>
    %cst_141 = arith.constant dense<0.000000e+00> : vector<16xf32>
    %197 = vector.multi_reduction <add>, %196, %cst_141 [1] : vector<16x32xf32> to vector<16xf32>
    %198 = vector.shape_cast %197 : vector<16xf32> to vector<16x1xf32>
    %cst_142 = arith.constant 3.200000e+01 : f32
    %199 = vector.broadcast %cst_142 : f32 to vector<16x1xf32>
    %200 = arith.divf %198, %199 : vector<16x1xf32>
    %201 = vector.broadcast %193 : vector<16x1xf32> to vector<16x32xf32>
    %202 = arith.subf %185, %201 : vector<16x32xf32>
    %cst_143 = arith.constant 9.99999974E-6 : f32
    %203 = vector.broadcast %cst_143 : f32 to vector<16x1xf32>
    %204 = arith.addf %200, %203 : vector<16x1xf32>
    %205 = math.rsqrt %204 : vector<16x1xf32>
    %206 = vector.broadcast %205 : vector<16x1xf32> to vector<16x32xf32>
    %207 = arith.mulf %202, %206 : vector<16x32xf32>
    %208 = vector.broadcast %187 : vector<1x32xf32> to vector<16x32xf32>
    %209 = arith.mulf %207, %208 : vector<16x32xf32>
    %210 = vector.broadcast %189 : vector<1x32xf32> to vector<16x32xf32>
    %211 = arith.addf %209, %210 : vector<16x32xf32>
    %cst_144 = arith.constant 5.000000e-01 : f32
    %212 = vector.broadcast %cst_144 : f32 to vector<16x1xf32>
    %213 = arith.cmpf ogt, %7, %212 : vector<16x1xf32>
    %cst_145 = arith.constant 0.000000e+00 : f32
    %214 = vector.shape_cast %213 : vector<16x1xi1> to vector<16x1xi1>
    %215 = vector.broadcast %214 : vector<16x1xi1> to vector<16x32xi1>
    %216 = vector.broadcast %cst_145 : f32 to vector<16x32xf32>
    %217 = arith.select %215, %216, %211 : vector<16x32xi1>, vector<16x32xf32>
    %218 = vector.shape_cast %217 : vector<16x32xf32> to vector<2x8x32xf32>
    %c0_146 = arith.constant 0 : index
    %c0_147 = arith.constant 0 : index
    %c0_148 = arith.constant 0 : index
    %219 = vector.load %arg17[%c0_146, %c0_147, %c0_148] : memref<2x8x32xf32, #tpu.memory_space<vmem>>, vector<2x8x32xf32>
    tpu.vector_store %arg17[%c0_146, %c0_147, %c0_148], %218 {strides = array<i32>} : memref<2x8x32xf32, #tpu.memory_space<vmem>>, vector<2x8x32xf32>,
    return
  }
  func.func @transform_0(%arg0: i32, %arg1: i32) -> (i32, i32, i32) {
    %c0_i32 = arith.constant 0 : i32
    %c0_i32_0 = arith.constant 0 : i32
    %c0_i32_1 = arith.constant 0 : i32
    return %arg0, %c0_i32, %c0_i32_0 : i32, i32, i32
  }
  func.func @transform_1(%arg0: i32, %arg1: i32) -> (i32, i32, i32) {
    %c0_i32 = arith.constant 0 : i32
    %c0_i32_0 = arith.constant 0 : i32
    %c0_i32_1 = arith.constant 0 : i32
    return %arg0, %c0_i32, %c0_i32_0 : i32, i32, i32
  }
  func.func @transform_2(%arg0: i32, %arg1: i32) -> (i32, i32, i32) {
    %c0_i32 = arith.constant 0 : i32
    %c0_i32_0 = arith.constant 0 : i32
    %c0_i32_1 = arith.constant 0 : i32
    return %arg0, %c0_i32, %c0_i32_0 : i32, i32, i32
  }
  func.func @transform_3(%arg0: i32, %arg1: i32) -> (i32, i32, i32) {
    %c0_i32 = arith.constant 0 : i32
    %c0_i32_0 = arith.constant 0 : i32
    %c0_i32_1 = arith.constant 0 : i32
    return %arg1, %c0_i32, %c0_i32_0 : i32, i32, i32
  }
  func.func @transform_4(%arg0: i32, %arg1: i32) -> (i32, i32, i32) {
    %c0_i32 = arith.constant 0 : i32
    %c0_i32_0 = arith.constant 0 : i32
    %c0_i32_1 = arith.constant 0 : i32
    return %arg1, %c0_i32, %c0_i32_0 : i32, i32, i32
  }
  func.func @transform_5(%arg0: i32, %arg1: i32) -> (i32, i32, i32) {
    %c0_i32 = arith.constant 0 : i32
    %c0_i32_0 = arith.constant 0 : i32
    %c0_i32_1 = arith.constant 0 : i32
    return %arg1, %c0_i32, %c0_i32_0 : i32, i32, i32
  }
  func.func @transform_6(%arg0: i32, %arg1: i32) -> (i32, i32, i32) {
    %c0_i32 = arith.constant 0 : i32
    %c0_i32_0 = arith.constant 0 : i32
    %c0_i32_1 = arith.constant 0 : i32
    return %arg1, %c0_i32, %c0_i32_0 : i32, i32, i32
  }
  func.func @transform_7(%arg0: i32, %arg1: i32) -> (i32, i32, i32) {
    %c0_i32 = arith.constant 0 : i32
    %c0_i32_0 = arith.constant 0 : i32
    %c0_i32_1 = arith.constant 0 : i32
    return %arg1, %c0_i32, %c0_i32_0 : i32, i32, i32
  }
  func.func @transform_8(%arg0: i32, %arg1: i32) -> (i32, i32, i32) {
    %c0_i32 = arith.constant 0 : i32
    %c0_i32_0 = arith.constant 0 : i32
    %c0_i32_1 = arith.constant 0 : i32
    return %arg1, %c0_i32, %c0_i32_0 : i32, i32, i32
  }
  func.func @transform_9(%arg0: i32, %arg1: i32) -> (i32, i32, i32, i32) {
    %c0_i32 = arith.constant 0 : i32
    %c0_i32_0 = arith.constant 0 : i32
    %c0_i32_1 = arith.constant 0 : i32
    %c0_i32_2 = arith.constant 0 : i32
    return %arg1, %c0_i32, %c0_i32_0, %c0_i32_1 : i32, i32, i32, i32
  }
  func.func @transform_10(%arg0: i32, %arg1: i32) -> (i32, i32, i32) {
    %c0_i32 = arith.constant 0 : i32
    %c0_i32_0 = arith.constant 0 : i32
    %c0_i32_1 = arith.constant 0 : i32
    return %arg1, %c0_i32, %c0_i32_0 : i32, i32, i32
  }
  func.func @transform_11(%arg0: i32, %arg1: i32) -> (i32, i32, i32) {
    %c0_i32 = arith.constant 0 : i32
    %c0_i32_0 = arith.constant 0 : i32
    %c0_i32_1 = arith.constant 0 : i32
    return %arg1, %c0_i32, %c0_i32_0 : i32, i32, i32
  }
  func.func @transform_12(%arg0: i32, %arg1: i32) -> (i32, i32, i32) {
    %c0_i32 = arith.constant 0 : i32
    %c0_i32_0 = arith.constant 0 : i32
    %c0_i32_1 = arith.constant 0 : i32
    return %arg1, %c0_i32, %c0_i32_0 : i32, i32, i32
  }
  func.func @transform_13(%arg0: i32, %arg1: i32) -> (i32, i32, i32) {
    %c0_i32 = arith.constant 0 : i32
    %c0_i32_0 = arith.constant 0 : i32
    %c0_i32_1 = arith.constant 0 : i32
    return %arg1, %c0_i32, %c0_i32_0 : i32, i32, i32
  }
  func.func @transform_14(%arg0: i32, %arg1: i32) -> (i32, i32, i32) {
    %c0_i32 = arith.constant 0 : i32
    %c0_i32_0 = arith.constant 0 : i32
    %c0_i32_1 = arith.constant 0 : i32
    return %arg1, %c0_i32, %c0_i32_0 : i32, i32, i32
  }
  func.func @transform_15(%arg0: i32, %arg1: i32) -> (i32, i32, i32) {
    %c0_i32 = arith.constant 0 : i32
    %c0_i32_0 = arith.constant 0 : i32
    %c0_i32_1 = arith.constant 0 : i32
    return %arg0, %c0_i32, %c0_i32_0 : i32, i32, i32
  }
}

</mosaic_0001>

<bundles_post_ra>
// kernel: tpu_custom_call.1
= control target key start
LH: loop header
LB: loop body
LE: loop exit
PB: predicated region body
PF: predicated region fallthrough
CT: control target
= control target key end

     0   :  { %s4157_s0 = inlined_call_operand.vmem [shape: f32[2,8,32], index: 0, kind: input, shape index: {}]   ;;  %s4158_s1 = inlined_call_operand.vmem [shape: f32[2,1,8], index: 1, kind: input, shape index: {}]   ;;  %s4159_s2 = inlined_call_operand.vmem [shape: f32[2,8,1], index: 2, kind: input, shape index: {}]   ;;  %s4160_s3 = inlined_call_operand.vmem [shape: f32[2,32,96], index: 3, kind: input, shape index: {}]   ;;  %s4161_s4 = inlined_call_operand.vmem [shape: f32[2,1,96], index: 4, kind: input, shape index: {}]   ;;  %s4162_s5 = inlined_call_operand.vmem [shape: f32[2,32,32], index: 5, kind: input, shape index: {}]   ;;  %s4163_s6 = inlined_call_operand.vmem [shape: f32[2,1,32], index: 6, kind: input, shape index: {}]   ;;  %s4164_s7 = inlined_call_operand.vmem [shape: f32[2,1,32], index: 7, kind: input, shape index: {}]   ;;  %s4165_s8 = inlined_call_operand.vmem [shape: f32[2,1,32], index: 8, kind: input, shape index: {}]   ;;  %s4166_s9 = inlined_call_operand.hbm [shape: f32[2,9,32,64], index: 9, kind: input, shape index: {}]   ;;  %s4167_s10 = inlined_call_operand.vmem [shape: f32[2,1,64], index: 10, kind: input, shape index: {}]   ;;  %s4168_s11 = inlined_call_operand.vmem [shape: f32[2,64,32], index: 11, kind: input, shape index: {}]   ;;  %s4169_s12 = inlined_call_operand.vmem [shape: f32[2,1,32], index: 12, kind: input, shape index: {}]   ;;  %s4170_s13 = inlined_call_operand.vmem [shape: f32[2,1,32], index: 13, kind: input, shape index: {}]   ;;  %s4171_s14 = inlined_call_operand.vmem [shape: f32[2,1,32], index: 14, kind: input, shape index: {}]   ;;  %s4172_s15 = inlined_call_operand.hbm [shape: f32[2,8,32], index: 15, kind: output, shape index: {}]  }
   0x1   :  { %4183 = sst [smem:[#allocation17_spill]] %s4158_s1 }
   0x2   :  { %4184 = sst [smem:[#allocation18_spill]] %s4159_s2 }
   0x3   :  { %4185 = sst [smem:[#allocation19_spill]] %s4160_s3 }
   0x4   :  { %4186 = sst [smem:[#allocation20_spill]] %s4162_s5 }
   0x5   :  { %4187 = sst [smem:[#allocation21_spill]] %s4166_s9 }
   0x6   :  { %4188 = sst [smem:[#allocation22_spill]] %s4172_s15 }
   0x7   :  { %20 = vsyncpa [#allocation5], 0 }
   0x8   :  { %22 = vsyncpa [#allocation5 + $0x1], 0 }
   0x9   :  { %23 = vsyncpa [#allocation6], 0  ;;  %s3708_s18 = smov 0   ;;  %s3710_s19 = smov 0  }
   0xa   :  { %s3712_s20 = smov 0   ;;  %s3714_s21 = smov 0  }
   0xb   :  { %s3716_s22 = smov 0   ;;  %s3718_s23 = smov 0  }
   0xc LB: > { %4189 = sst [smem:[#allocation10_spill]] %s3594_s19  ;;  %s4176_s24 = sadd.s32 4294967295, %s3610_s23   ;;  %s3610_s23 = sphi %s3718_s23, %s29_s23   ;;  %s3606_s22 = sphi %s3716_s22, %s4218_s22   ;;  %s3602_s21 = sphi %s3714_s21, %s4217_s21   ;;  %s3598_s20 = sphi %s3712_s20, %s4216_s20   ;;  %s3594_s19 = sphi %s3710_s19, %s4215_s19   ;;  %s3590_s18 = sphi %s3708_s18, %s4214_s18  }
   0xd   : > { %4190 = sst [smem:[#allocation11_spill]] %s3598_s20  ;;  %s38_s25 = sadd.s32 1, %s3606_s22 }
   0xe   : > { %4191 = sst [smem:[#allocation12_spill]] %s3606_s22  ;;  %p39_p0 = scmp.ge.s32.totalorder %s38_s25, 2 }
   0xf   : > { %4192 = sst [smem:[#allocation13_spill]] %s3610_s23  ;;  %s282_s26 = sadd.s32 1, %s3598_s20 }
  0x10   : > { %p289_p1 = scmp.ne.s32.totalorder %s3598_s20, %s3594_s19  ;;  %p290_p2 = scmp.eq.s32.totalorder %s3610_s23, 0 }
  0x11   : > { %s4220_s25 = smov (%p39_p0, %s38_s25), 0  ;;  %p295_p4 = scmp.ne.s32.totalorder %s3594_s19, %s3590_s18 }
  0x12   : > { %4193 = sst [smem:[#allocation14_spill]] %s4220_s25  ;;  %p291_p3 = por %p290_p2, %p289_p1 }
  0x13   : > { %s279_s27 = ssub.s32 %s3606_s22, %s4220_s25  ;;  %p296_p5 = scmp.eq.s32.totalorder %s4176_s24, 0 }
  0x14   : > { %p280_p6 = scmp.eq.s32.totalorder %s279_s27, 0  ;;  %p3408_p8 = scmp.lt.s32.totalorder %s3610_s23, 2 }
  0x15   : > { %p3749_p7 = por %p296_p5, %p295_p4  ;;  %s541_s30 = sand.u32 1, %s3598_s20  }
  0x16   : > { %s3755_s29 = scalar_select %p280_p6, %s3598_s20, %s282_s26  }
  0x17   : > { %s3396_s16 = smul.u32 4608, %s3606_s22  ;;  %s4196_s9 = sld [smem:[#allocation21_spill]] }
  0x18   : > { %4195 = sst [smem:[#allocation15_spill]] %s3755_s29  ;;  %s3395_s17 = smul.u32 288, %s541_s30 }
  0x19   : > { %p3764_p9 = pnand %p3408_p8, %p291_p3  ;;  %s3770_s24 = scalar_lea.sflag [#allocation5], %s541_s30 }
  0x1a   : > { %s545_s26 = scalar_lea.vmem [#allocation4], %s3395_s17 }
  0x1b   : > { %s552_s27 = sshll.u32 %s545_s26, 4  ;;  %p3502_p11 = pneg %p3764_p9  ;;  %s3768_s27 = int_to_ptr.vmem [resolvable:$true] %s552_s27 }
  0x1d   : > { %s3762_s1 = scalar_lea.hbm %s4196_s9, %s3396_s16  ;;  %s3505_s16 = scalar_lea.hbm %s4196_s9, 9216 }
  0x1e   : > { %s3500_s25 = scalar_lea.hbm %s3762_s1, 4608  ;;  %p3506_p0 = scmp.lt.u32.totalorder %s3762_s1, %s4196_s9 }
  0x1f   : > { %p3501_p10 = scmp.ne.s32.totalorder %s3762_s1, %s3500_s25  ;;  %p3507_p1 = scmp.lt.u32.totalorder %s3505_s16, %s3500_s25 }
  0x20   : > { %p3509_p3 = scmp.lt.u32.totalorder %s3500_s25, %s3762_s1 }
  0x21   : > { %p3503_p12 = pnand %p3502_p11, %p3501_p10  ;;  %p3508_p2 = por %p3507_p1, %p3506_p0 }
  0x23   : > { %p3504_p13 = pneg %p3503_p12  ;;  %p3510_p4 = por %p3509_p3, %p3508_p2 }
  0x25   : > { %p3511_p5 = pnand %p3510_p4, %p3504_p13 }
  0x27   : > { %3514 = shalt.err (!%p3511_p5)
}
  0x28   : > { %s3515_s30 = scalar_lea.vmem %s3768_s27, 4608  ;;  %s3612_s17 = smov [#allocation4]  }
  0x29   : > { %p3516_p6 = scmp.ne.s32.totalorder %s3768_s27, %s3515_s30  ;;  %s3520_s26 = sshll.u32 %s3612_s17, 4  ;;  %s3521_s26 = int_to_ptr.vmem [resolvable:$false] %s3520_s26 }
  0x2a   : > { %s3522_s22 = scalar_lea.vmem %s3521_s26, 9216  ;;  %p3523_p12 = scmp.lt.s32.totalorder %s3768_s27, %s3521_s26 }
  0x2b   : > { %p3518_p8 = pnand %p3516_p6, %p3502_p11  ;;  %p3524_p0 = scmp.lt.s32.totalorder %s3522_s22, %s3515_s30 }
  0x2d   : > { %p3519_p10 = pneg %p3518_p8  ;;  %p3525_p1 = por %p3524_p0, %p3523_p12 }
  0x2f   : > { %p3526_p2 = pnand %p3525_p1, %p3519_p10 }
  0x31   : > { %3529 = shalt.err (!%p3526_p2)
}
  0x32   : > { %s3613_s25 = smov 128   ;;  %s3614_s29 = smov 8  }
  0x33   : > { %3407 = dma.hbm_to_vmem [thread:$0]  (!%p3764_p9), %s3762_s1, 4608, %s3768_s27, %s3770_s24, %s3613_s25, %s3613_s25, %s3614_s29  }
  0x34   : > { %p2912_p11 = scmp.ge.s32.totalorder %s3610_s23, 1  ;;  %p592_p13 = scmp.lt.s32.totalorder %s3610_s23, 3 }
  0x36   : > { %p593_p3 = pnand %p2912_p11, %p592_p13 }
  0x38   : > { %596 = sbr.rel (%p593_p3) target bundleno = 3185 (0xc71), region = 80 }
  0x3f   : > { %s598_s2 = sand.u32 1, %s3594_s19  }
  0x40   : > { %s3397_s15 = smul.u32 288, %s598_s2  ;;  %s599_s16 = scalar_lea.sflag [#allocation5], %s598_s2 }
  0x42   : > { %s3801_s30 = scalar_lea.vmem [#allocation4], %s3397_s15 }
  0x43   : > { %4198 = sst [smem:[#allocation16_spill]] %s3801_s30 }
  0x44   : > { %3581 = dma.done.wait (%p3749_p7), %s599_s16, 4608  }
  0x45   : > { %3583 = vsyncadd (%p3749_p7), %s599_s16, 4294962688  ;;  %p714_p4 = scmp.lt.s32.totalorder %s3602_s21, 1  ;;  %s4199_s3 = sld [smem:[#allocation19_spill]] }
  0x46   : > { %s4200_s5 = sld [smem:[#allocation20_spill]]  ;;  %p2919_p7 = scmp.ne.s32.totalorder %s3602_s21, 0 }
  0x47   : > { %s3809_s1 = scalar_select %p714_p4, %s3602_s21, 1 }
  0x48   : > { %757 = sbr.rel (%p2919_p7) target bundleno = 79 (0x4f), region = 88  ;;  %v758_v0 = vld [vmem:[%s4157_s0] sm:$0xff] (!%p2919_p7)  ;;  %vm760_vm0 = vcmask (!%p2919_p7), 261120   ;;  %v759_v1 = vld [vmem:[%s4157_s0 + $0x8] sm:$0xff] (!%p2919_p7)  ;;  %vm763_vm1 = vcmask (!%p2919_p7), 257024   ;;  %v3615_v2 = vmov (!%p2919_p7), 0.0  }
  0x49   : > { %s3000_s24 = sshll.u32 %s3809_s1, 5  ;;  %s729_s9 = scalar_lea.vmem %s4163_s6, %s3809_s1  ;;  %761 = vst.msk [vmem:[#allocation7] sm:$0xff] (!%p2919_p7), %vm760_vm0, %v758_v0  ;;  %762 = vst.msk [vmem:[#allocation7 + $0x8] sm:$0xff] (!%p2919_p7), %vm760_vm0, %v759_v1 }
  0x4a   : > { %s738_s26 = scalar_lea.vmem %s4167_s10, %s3809_s1  ;;  %s746_s29 = scalar_lea.vmem %s4169_s12, %s3809_s1  ;;  %764 = vst.msk [vmem:[#allocation3] sm:$0xf] (!%p2919_p7), %vm763_vm1, %v3615_v2  ;;  %765 = vst.msk [vmem:[#allocation3 + $0x10] sm:$0xf] (!%p2919_p7), %vm763_vm1, %v3615_v2 }
  0x4b   : > { %s718_s22 = scalar_lea.vmem %s4199_s3, %s3000_s24  ;;  %s3002_s3 = sshll.u32 %s3809_s1, 6  ;;  %766 = vst.msk [vmem:[#allocation3 + $0xc] sm:$0xf] (!%p2919_p7), %vm763_vm1, %v3615_v2  ;;  %767 = vst.msk [vmem:[#allocation3 + $0x1c] sm:$0xf] (!%p2919_p7), %vm763_vm1, %v3615_v2 }
  0x4c   : > { %s3822_s2 = scalar_lea.vmem %s4200_s5, %s3000_s24  ;;  %s3848_s16 = scalar_lea.vmem %s4168_s11, %s3002_s3 }
  0x4d   : > { %s749_s23 = scalar_lea.vmem %s4170_s13, %s3809_s1  ;;  %s752_s27 = scalar_lea.vmem %s4171_s14, %s3809_s1 }
  0x4f PF: > { %v774_v3 = vld [vmem:[%s718_s22] sm:$0xff]  ;;  %v775_v4 = vld [vmem:[%s718_s22 + $0x8] sm:$0xff]  ;;  %v776_v5 = vld [vmem:[%s718_s22 + $0x10] sm:$0xff]  ;;  %vm785_vm2 = vcmask 261120   ;;  %v3616_v11 = vmov 0.0   ;;  %vm3617_vm3 = vmmov 0   ;;  %v1028_v20 = vlaneseq }
  0x50   : > { %v3275_v6 = vpack.c.bf16 %v775_v4, %v774_v3  ;;  %v777_v7 = vld [vmem:[%s718_s22 + $0x18] sm:$0xff]  ;;  %v3865_v8 = vld [vmem:[#allocation7] sm:$0xff]  ;;  %3106 = vmatprep.subr.mxu1 %v3616_v11  ;;  %3108 = vmatprep.mubr.msk.f32.mxu1 %vm3617_vm3, %v3616_v11  ;;  %s4201_s22 = scalar_lea.vmem %s4161_s4, %s3809_s1  ;;  %s3618_s24 = smov 96   ;;  %vm870_vm4 = vcmask 130048   ;;  %v3619_v19 = vmov 0   ;;  %vm1040_vm8 = vcmask 64512  }
  0x51   : > { %v3279_v9 = vpack.c.bf16 %v777_v7, %v776_v5  ;;  %3103 = vmatprep.mubr.msk.f32.mxu0 %vm785_vm2, %v3865_v8  ;;  %v3869_v10 = vld [vmem:[#allocation7 + $0x8] sm:$0xff]  ;;  %v2920_v12 = vld [vmem:[%s4201_s22] ss:$0 sm:$0xff]  ;;  %3475 = vset.pattern.permute.xlu0 %v3619_v19  ;;  %s4202_s20 = sld [smem:[#allocation17_spill]]  ;;  %v1029_v22 = vshrl.u32 %v1028_v20, 7  ;;  %s3620_s17 = smov 64  }
  0x52   : > { %3276 = vmatprep.subr.bf16.mxu0 %v3275_v6  ;;  %3474 = vset.pattern.permute.xlu1 %v3619_v19  ;;  %s3621_s25 = smov 80   ;;  %s3622_s5 = smov 112   ;;  %vm1559_vm10 = vcmask 261248   ;;  %vm2550_vm15 = vcmask 523264  }
  0x53   : > { %3278 = vmatpush3.bf16.msra.mxu0 %v3275_v6  ;;  %v1030_v24 = vsub.s32 0, %v1029_v22  ;;  %s3623_s3 = smov 48   ;;  %s3624_s21 = smov 16  }
  0x54   : > { %3280 = vmatprep.subr.bf16.mxu0 %v3279_v9  ;;  %s4204_s19 = sld [smem:[#allocation18_spill]]  ;;  %s3625_s18 = smov [#allocation7]  }
  0x57   : > { %3282 = vmatpush3.bf16.msra.mxu0 %v3279_v9  ;;  %s4203_s30 = smov %s4202_s20  ;;  %v770_v21 = vld [vmem:[%s4202_s20] sm:$0x1] }
  0x58   : > { %3116 = vmatprep.subr.mxu0 %v3616_v11  ;;  %vm1024_vm5 = vcmp.gt.f32.partialorder %v770_v21, 0.5  ;;  %v771_v23 = vld [vmem:[%s4203_s30 + $0x1] sm:$0x1] }
  0x59   : > { %v1026_v25 = vsel %vm1024_vm5, 1, %v3619_v19  ;;  %vm1025_vm6 = vcmp.gt.f32.partialorder %v771_v23, 0.5 }
  0x5a   : > { %3104 = vmatmul.mubr.msk.f32.vlgmr.msra.gmra.mrb[0].mxu0 %vm785_vm2, %v3869_v10  ;;  %v3911_v26 = vrot.slane %v1026_v25, %v1030_v24  ;;  %v1027_v27 = vsel %vm1025_vm6, 1, %v3619_v19  ;;  %s4205_s28 = smov %s4204_s19 }
  0x5b   : > { %3118 = vmatprep.mubr.msk.f32.mxu0 %vm3617_vm3, %v3616_v11  ;;  %v3915_v29 = vrot.slane %v1027_v27, %v1030_v24 }
  0x5c   : > { %vm1036_vm7 = vcmp.eq.s32.totalorder %v3911_v26, 1 }
  0x5d   : > { %vm1037_vm9 = vcmp.eq.s32.totalorder %v3915_v29, 1 }
 0x12d   : > { %v3105_v13 = vpop.f32.mrb[0].mxu0 }
 0x12e   : > { %v858_v14 = vpop.f32.mrb[1].mxu0  ;;  %v3887_v16 = vadd.f32 %v3105_v13, %v2920_v12 }
 0x12f   : > { %v3884_v15 = vadd.f32 %v2920_v12, %v858_v14 }
 0x131   : > { %868 = vrot.lane.b32.xlu0 %v3884_v15, %s3618_s24 }
 0x135   : > { %946 = vrot.lane.b32.xlu0 %v3887_v16, %s3618_s24 }
 0x1a3   : > { %v869_v17 = vpop.permute.xlu0 %868 }
 0x1a4   : > { %3107 = vmatpush3.xpose.msk.msra.mxu1 %vm870_vm4, %v869_v17 }
 0x1a5   : > { %3111 = vmatprep.subr.mxu1 %v3616_v11 }
 0x1a7   : > { %3109 = vmatmul.mubr.msk.f32.vlgmr.msra.gmra.mrb[0].mxu1 %vm870_vm4, %v3884_v15  ;;  %v947_v18 = vpop.permute.xlu0 %946 }
 0x1a8   : > { %3112 = vmatpush3.xpose.msk.msra.mxu1 %vm870_vm4, %v947_v18  ;;  %3113 = vmatprep.mubr.msk.f32.mxu1 %vm3617_vm3, %v3616_v11 }
 0x1a9   : > { %3121 = vmatprep.subr.mxu1 %v3616_v11 }
 0x1ab   : > { %3114 = vmatmul.mubr.msk.f32.vlgmr.msra.gmra.mrb[2].mxu1 %vm870_vm4, %v3887_v16 }
 0x1ac   : > { %3123 = vmatprep.mubr.msk.f32.mxu1 %vm3617_vm3, %v3616_v11 }
 0x27a   : > { %v941_v28 = vpop.f32.mrb[0].mxu1 }
 0x27b   : > { %v1022_v30 = vmul.f32 0.25, %v941_v28  ;;  %v3110_v31 = vpop.f32.mrb[1].mxu1 }
 0x27d   : > { %v1038_v32 = vsel %vm1036_vm7, -1e+30, %v1022_v30 }
 0x27e   : > { %v1018_v33 = vpop.f32.mrb[2].mxu1  ;;  %v1041_v34 = vsel %vm1040_vm8, %v1038_v32, -inf }
 0x27f   : > { %v1023_v35 = vmul.f32 0.25, %v1018_v33  ;;  %1042 = vmax.xlane.f32.xlu1 %v1041_v34  ;;  %v3115_v36 = vpop.f32.mrb[3].mxu1  ;;  %v1564_v33 = vld [vmem:[%s3822_s2] sm:$0xff]  ;;  %v1565_v34 = vld [vmem:[%s3822_s2 + $0x8] sm:$0xff] }
 0x280   : > { %v1567_v36 = vld [vmem:[%s3822_s2 + $0x18] sm:$0xff] }
 0x281   : > { %v1039_v37 = vsel %vm1037_vm9, -1e+30, %v1023_v35  ;;  %v3283_v35 = vpack.c.bf16 %v1565_v34, %v1564_v33 }
 0x282   : > { %v1044_v38 = vsel %vm1040_vm8, %v1039_v37, -inf }
 0x283   : > { %1045 = vmax.xlane.f32.xlu1 %v1044_v38 }
 0x294   : > { %1063 = vrot.lane.b32.xlu1 %v3884_v15, %s3620_s17 }
 0x298   : > { %1139 = vrot.lane.b32.xlu1 %v3887_v16, %s3620_s17  ;;  %s2691_s17 = sshll.u32 %s3625_s18, 4  ;;  %s2692_s17 = int_to_ptr.vmem [resolvable:$true] %s2691_s17 }
 0x299   : > { %p3537_p10 = scmp.lt.s32.totalorder %s2692_s17, %s2692_s17 }
 0x29c   : > { %1219 = vrot.lane.b32.xlu1 %v3884_v15, %s3621_s25 }
 0x2a0   : > { %1297 = vrot.lane.b32.xlu1 %v3887_v16, %s3621_s25 }
 0x30c   : > { %v1043_v39 = vpop.xlane.xlu1 %1042 }
 0x30d   : > { %v1047_v40 = vsub.f32 %v1038_v32, %v1043_v39 }
 0x30f   : > { %v1049_v41 = vmul.f32 1.442695, %v1047_v40 }
 0x310   : > { %v1046_v42 = vpop.xlane.xlu1 %1045 }
 0x311   : > { %3476 = vpow2.f32 %v1049_v41  ;;  %v1048_v43 = vsub.f32 %v1039_v37, %v1046_v42 }
 0x313   : > { %v1051_v44 = vmul.f32 1.442695, %v1048_v43 }
 0x314   : > { %v1064_v45 = vpop.permute.xlu1 %1063 }
 0x315   : > { %3478 = vpow2.f32 %v1051_v44  ;;  %3117 = vmatpush3.msra.mxu0 %v1064_v45 }
 0x316   : > { %3126 = vmatprep.subr.mxu0 %v3616_v11 }
 0x318   : > { %v1140_v46 = vpop.permute.xlu1 %1139 }
 0x319   : > { %3122 = vmatpush3.msra.mxu1 %v1140_v46  ;;  %v2935_v46 = vld [vmem:[%s729_s9] ss:$0 sm:$0xff]  ;;  %s4206_s9 = sld [smem:[#allocation16_spill]] }
 0x31a   : > { %3131 = vmatprep.subr.mxu1 %v3616_v11 }
 0x31b   : > { %v3477_v47 = vpop.eup %3476 }
 0x31c   : > { %v1053_v48 = vsel %vm1040_vm8, %v3477_v47, 0.0  ;;  %v1220_v51 = vpop.permute.xlu1 %1219 }
 0x31d   : > { %1054 = vadd.xlane.f32.xlu0 %v1053_v48 }
 0x31f   : > { %v3479_v49 = vpop.eup %3478 }
 0x320   : > { %v1056_v50 = vsel %vm1040_vm8, %v3479_v49, 0.0  ;;  %v1298_v52 = vpop.permute.xlu1 %1297 }
 0x321   : > { %1057 = vadd.xlane.f32.xlu1 %v1056_v50 }
 0x332   : > { %1295 = vrot.lane.b32.xlu1 %v3887_v16, %s3622_s5 }
 0x333   : > { %1217 = vrot.lane.b32.xlu0 %v3884_v15, %s3622_s5  ;;  %s4207_s5 = scalar_lea.vmem %s4164_s7, %s3809_s1 }
 0x3aa   : > { %v1055_v53 = vpop.xlane.xlu0 %1054 }
 0x3ab   : > { %3480 = vrcp.f32 %v1055_v53 }
 0x3ae   : > { %v1058_v54 = vpop.xlane.xlu1 %1057  ;;  %v1218_v59 = vpop.permute.xlu0 %1217 }
 0x3af   : > { %3482 = vrcp.f32 %v1058_v54 }
 0x3b2   : > { %v1296_v60 = vpop.permute.xlu1 %1295 }
 0x3b5   : > { %v3481_v55 = vpop.eup %3480 }
 0x3b6   : > { %v1061_v56 = vmul.f32 %v3481_v55, %v3477_v47  ;;  %v772_v55 = vld [vmem:[%s4204_s19] sm:$0xff] }
 0x3b7   : > { %vm1703_vm11 = vcmp.gt.f32.partialorder %v772_v55, 0.5 }
 0x3b8   : > { %3119 = vmatmul.mubr.msk.f32.vlgmr.msra.gmra.mrb[2].mxu0 %vm1040_vm8, %v1061_v56  ;;  %v1705_v56 = vsel %vm1703_vm11, 1, %v3619_v19 }
 0x3b9   : > { %v3483_v57 = vpop.eup %3482  ;;  %3127 = vmatpush3.xpose.msk.msra.mxu0 %vm870_vm4, %v1220_v51  ;;  %3128 = vmatprep.mubr.msk.f32.mxu0 %vm3617_vm3, %v3616_v11 }
 0x3ba   : > { %v1062_v58 = vmul.f32 %v3483_v57, %v3479_v49  ;;  %3136 = vmatprep.subr.mxu0 %v3616_v11 }
 0x3bc   : > { %3124 = vmatmul.mubr.msk.f32.vlgmr.msra.gmra.mrb[4].mxu1 %vm1040_vm8, %v1062_v58  ;;  %3129 = vmatmul.mubr.msk.f32.vlgmr.msra.gmra.mrb[4].mxu0 %vm870_vm4, %v1218_v59 }
 0x3bd   : > { %3132 = vmatpush3.xpose.msk.msra.mxu1 %vm870_vm4, %v1298_v52  ;;  %3133 = vmatprep.mubr.msk.f32.mxu1 %vm3617_vm3, %v3616_v11 }
 0x3be   : > { %3141 = vmatprep.subr.mxu1 %v3616_v11  ;;  %3138 = vmatprep.mubr.msk.f32.mxu0 %vm3617_vm3, %v3616_v11 }
 0x3c0   : > { %3134 = vmatmul.mubr.msk.f32.vlgmr.msra.gmra.mrb[6].mxu1 %vm870_vm4, %v1296_v60 }
 0x3c1   : > { %3143 = vmatprep.mubr.msk.f32.mxu1 %vm3617_vm3, %v3616_v11 }
 0x48b   : > { %v1135_v61 = vpop.f32.mrb[2].mxu0 }
 0x48c   : > { %1215 = vst.msk [vmem:[#allocation2] sm:$0xff] %vm870_vm4, %v1135_v61  ;;  %v3120_v62 = vpop.f32.mrb[3].mxu0 }
 0x48f   : > { %v1211_v63 = vpop.f32.mrb[4].mxu1  ;;  %v1291_v0 = vpop.f32.mrb[4].mxu0 }
 0x490   : > { %1216 = vst.msk [vmem:[#allocation2 + $0x8] sm:$0xff] %vm870_vm4, %v1211_v63  ;;  %v1373_v1 = vmul.f32 0.25, %v1291_v0  ;;  %v3125_v2 = vpop.f32.mrb[5].mxu1  ;;  %v3130_v3 = vpop.f32.mrb[5].mxu0 }
 0x491   : > { %v2940_v3 = vld [vmem:[%s4206_s9 + $0x20] sm:$0xff] }
 0x492   : > { %v1375_v4 = vsel %vm1036_vm7, -1e+30, %v1373_v1  ;;  %v773_v1 = vld [vmem:[%s4205_s28 + $0x8] sm:$0xff] }
 0x493   : > { %v1369_v5 = vpop.f32.mrb[6].mxu1  ;;  %v1377_v6 = vsel %vm1040_vm8, %v1375_v4, -inf  ;;  %vm1704_vm12 = vcmp.gt.f32.partialorder %v773_v1, 0.5 }
 0x494   : > { %v1374_v7 = vmul.f32 0.25, %v1369_v5  ;;  %v3135_v9 = vpop.f32.mrb[7].mxu1  ;;  %1378 = vmax.xlane.f32.xlu1 %v1377_v6  ;;  %v1706_v2 = vsel %vm1704_vm12, 1, %v3619_v19  ;;  %v2954_v5 = vld [vmem:[%s4206_s9 + $0x60] sm:$0xff] }
 0x495   : > { %v2942_v9 = vld [vmem:[%s4206_s9 + $0x30] sm:$0xff]  ;;  %v1721_v19 = vld [vmem:[%s4206_s9] sm:$0xff] }
 0x496   : > { %v1376_v11 = vsel %vm1037_vm9, -1e+30, %v1374_v7  ;;  %v2955_v7 = vld [vmem:[%s4206_s9 + $0x68] sm:$0xff] }
 0x497   : > { %v1380_v12 = vsel %vm1040_vm8, %v1376_v11, -inf }
 0x498   : > { %1381 = vmax.xlane.f32.xlu0 %v1380_v12  ;;  %v3315_v12 = vpack.c.bf16 %v2955_v7, %v2954_v5 }
 0x4ae   : > { %1475 = vrot.lane.b32.xlu0 %v3887_v16, %s3623_s3 }
 0x521   : > { %v1379_v13 = vpop.xlane.xlu1 %1378 }
 0x522   : > { %v1383_v14 = vsub.f32 %v1375_v4, %v1379_v13  ;;  %v2941_v4 = vld [vmem:[%s4206_s9 + $0x28] sm:$0xff] }
 0x523   : > { %v3291_v6 = vpack.c.bf16 %v2941_v4, %v2940_v3  ;;  %v2972_v3 = vld [vmem:[%s4206_s9 + $0xc0] sm:$0xff]  ;;  %v2973_v4 = vld [vmem:[%s4206_s9 + $0xc8] sm:$0xff] }
 0x524   : > { %v1385_v17 = vmul.f32 1.442695, %v1383_v14  ;;  %v2956_v14 = vld [vmem:[%s4206_s9 + $0x70] sm:$0xff]  ;;  %v3339_v7 = vpack.c.bf16 %v2973_v4, %v2972_v3 }
 0x525   : > { %v1382_v18 = vpop.xlane.xlu0 %1381 }
 0x526   : > { %3484 = vpow2.f32 %v1385_v17  ;;  %v1384_v20 = vsub.f32 %v1376_v11, %v1382_v18  ;;  %v2943_v11 = vld [vmem:[%s4206_s9 + $0x38] sm:$0xff] }
 0x527   : > { %v3295_v13 = vpack.c.bf16 %v2943_v11, %v2942_v9  ;;  %v2957_v17 = vld [vmem:[%s4206_s9 + $0x78] sm:$0xff]  ;;  %v2974_v9 = vld [vmem:[%s4206_s9 + $0xd0] sm:$0xff] }
 0x528   : > { %v1387_v21 = vmul.f32 1.442695, %v1384_v20  ;;  %v3319_v18 = vpack.c.bf16 %v2957_v17, %v2956_v14  ;;  %v1722_v20 = vld [vmem:[%s4206_s9 + $0x8] sm:$0xff]  ;;  %v2975_v11 = vld [vmem:[%s4206_s9 + $0xd8] sm:$0xff]  ;;  %v2978_v17 = vld [vmem:[%s4206_s9 + $0xe0] sm:$0xff] }
 0x529   : > { %v1476_v22 = vpop.permute.xlu0 %1475 }
 0x52a   : > { %3486 = vpow2.f32 %v1387_v21  ;;  %3142 = vmatpush3.msra.mxu1 %v1476_v22  ;;  %v2960_v21 = vld [vmem:[%s4206_s9 + $0x80] sm:$0xff]  ;;  %v3299_v22 = vpack.c.bf16 %v1722_v20, %v1721_v19 }
 0x52b   : > { %3316 = vmatprep.subr.bf16.mxu1 %v3315_v12 }
 0x530   : > { %v3485_v23 = vpop.eup %3484 }
 0x531   : > { %v1389_v24 = vsel %vm1040_vm8, %v3485_v23, 0.0 }
 0x532   : > { %1390 = vadd.xlane.f32.xlu1 %v1389_v24 }
 0x534   : > { %v3487_v25 = vpop.eup %3486 }
 0x535   : > { %v1392_v26 = vsel %vm1040_vm8, %v3487_v25, 0.0 }
 0x536   : > { %1393 = vadd.xlane.f32.xlu1 %v1392_v26 }
 0x547   : > { %1399 = vrot.lane.b32.xlu1 %v3884_v15, %s3623_s3  ;;  %v1566_v15 = vld [vmem:[%s3822_s2 + $0x10] sm:$0xff]  ;;  %s4208_s2 = scalar_lea.vmem %s4165_s8, %s3809_s1  ;;  %s3530_s1 = scalar_lea.vmem %s2692_s17, 256 }
 0x548   : > { %v3287_v37 = vpack.c.bf16 %v1567_v36, %v1566_v15  ;;  %v2939_v34 = vld [vmem:[%s4208_s2] ss:$0 sm:$0xff]  ;;  %p3531_p5 = scmp.ne.s32.totalorder %s2692_s17, %s3530_s1  ;;  %p3538_p12 = scmp.lt.s32.totalorder %s3530_s1, %s3530_s1 }
 0x54a   : > { %p3539_p0 = por %p3538_p12, %p3537_p10 }
 0x5bf   : > { %v1391_v16 = vpop.xlane.xlu1 %1390 }
 0x5c0   : > { %3488 = vrcp.f32 %v1391_v16 }
 0x5c3   : > { %v1394_v27 = vpop.xlane.xlu1 %1393 }
 0x5c4   : > { %3490 = vrcp.f32 %v1394_v27 }
 0x5c7   : > { %v1400_v28 = vpop.permute.xlu1 %1399 }
 0x5c8   : > { %3137 = vmatpush3.msra.mxu0 %v1400_v28 }
 0x5c9   : > { %3284 = vmatprep.subr.bf16.mxu0 %v3283_v35 }
 0x5ca   : > { %v3489_v29 = vpop.eup %3488 }
 0x5cb   : > { %v1397_v30 = vmul.f32 %v3489_v29, %v3485_v23  ;;  %v2961_v23 = vld [vmem:[%s4206_s9 + $0x88] sm:$0xff] }
 0x5cc   : > { %v3323_v24 = vpack.c.bf16 %v2961_v23, %v2960_v21  ;;  %v2980_v21 = vld [vmem:[%s4206_s9 + $0xf0] sm:$0xff] }
 0x5cd   : > { %3139 = vmatmul.mubr.msk.f32.vlgmr.msra.gmra.mrb[6].mxu0 %vm1040_vm8, %v1397_v30 }
 0x5ce   : > { %v3491_v31 = vpop.eup %3490  ;;  %3286 = vmatpush3.bf16.msra.mxu0 %v3283_v35 }
 0x5cf   : > { %v1398_v32 = vmul.f32 %v3491_v31, %v3487_v25  ;;  %3288 = vmatprep.subr.bf16.mxu0 %v3287_v37  ;;  %v2938_v31 = vld [vmem:[%s4207_s5] ss:$0 sm:$0xff] }
 0x5d1   : > { %3144 = vmatmul.mubr.msk.f32.vlgmr.msra.gmra.mrb[8].mxu1 %vm1040_vm8, %v1398_v32 }
 0x5d2   : > { %3290 = vmatpush3.bf16.msra.mxu0 %v3287_v37  ;;  %3318 = vmatpush3.bf16.msra.mxu1 %v3315_v12 }
 0x5d3   : > { %3292 = vmatprep.subr.bf16.mxu0 %v3291_v6  ;;  %3320 = vmatprep.subr.bf16.mxu1 %v3319_v18 }
 0x5d6   : > { %3322 = vmatpush3.bf16.msra.mxu1 %v3319_v18  ;;  %v2979_v18 = vld [vmem:[%s4206_s9 + $0xe8] sm:$0xff] }
 0x5d7   : > { %3324 = vmatprep.subr.bf16.mxu1 %v3323_v24  ;;  %v3347_v20 = vpack.c.bf16 %v2979_v18, %v2978_v17 }
 0x6a0   : > { %v1471_v38 = vpop.f32.mrb[6].mxu0 }
 0x6a1   : > { %1553 = vrot.lane.b32.xlu1 %v1471_v38, %s3624_s21  ;;  %v3140_v39 = vpop.f32.mrb[7].mxu0 }
 0x6a4   : > { %v1547_v40 = vpop.f32.mrb[8].mxu1 }
 0x6a5   : > { %1555 = vrot.lane.b32.xlu1 %v1547_v40, %s3624_s21  ;;  %v3145_v41 = vpop.f32.mrb[9].mxu1 }
 0x713   : > { %v1554_v42 = vpop.permute.xlu1 %1553 }
 0x714   : > { %1560 = vst.msk [vmem:[#allocation2] sm:$0xff] %vm1559_vm10, %v1554_v42 }
 0x717   : > { %v1556_v43 = vpop.permute.xlu1 %1555 }
 0x718   : > { %1561 = vst.msk [vmem:[#allocation2 + $0x8] sm:$0xff] %vm1559_vm10, %v1556_v43  ;;  %v1723_v43 = vld [vmem:[%s4206_s9 + $0x10] sm:$0xff] }
 0x71b   : > { %v1562_v44 = vld [vmem:[#allocation2] sm:$0xff] }
 0x71c   : > { %3154 = vmatprep.mubr.msk.f32.mxu0 %vm785_vm2, %v1562_v44  ;;  %v1724_v44 = vld [vmem:[%s4206_s9 + $0x18] sm:$0xff] }
 0x71f   : > { %v1563_v45 = vld [vmem:[#allocation2 + $0x8] sm:$0xff] }
 0x720   : > { %3155 = vmatmul.mubr.msk.f32.vlgmr.msra.gmra.mrb[8].mxu0 %vm785_vm2, %v1563_v45  ;;  %v2962_v45 = vld [vmem:[%s4206_s9 + $0x90] sm:$0xff] }
 0x721   : > { %3294 = vmatpush3.bf16.msra.mxu0 %v3291_v6 }
 0x722   : > { %3296 = vmatprep.subr.bf16.mxu0 %v3295_v13 }
 0x725   : > { %3298 = vmatpush3.bf16.msra.mxu0 %v3295_v13  ;;  %v3343_v13 = vpack.c.bf16 %v2975_v11, %v2974_v9 }
 0x726   : > { %3300 = vmatprep.subr.bf16.mxu0 %v3299_v22 }
 0x7f3   : > { %v3156_v47 = vpop.f32.mrb[8].mxu0 }
 0x7f4   : > { %v1653_v48 = vadd.f32 %v3156_v47, %v2935_v46  ;;  %v1647_v49 = vpop.f32.mrb[9].mxu0 }
 0x7f5   : > { %v1648_v50 = vadd.f32 %v2935_v46, %v1647_v49  ;;  %v2963_v46 = vld [vmem:[%s4206_s9 + $0x98] sm:$0xff]  ;;  %v2948_v49 = vld [vmem:[%s4206_s9 + $0x40] sm:$0xff] }
 0x7f6   : > { %v1657_v51 = vadd.f32 %v1653_v48, %v3869_v10 }
 0x7f7   : > { %v1656_v52 = vadd.f32 %v1648_v50, %v3865_v8 }
 0x7f8   : > { %v1663_v53 = vsel %vm785_vm2, %v1657_v51, 0.0 }
 0x7f9   : > { %1664 = vadd.xlane.f32.xlu1 %v1663_v53  ;;  %v1660_v54 = vsel %vm785_vm2, %v1656_v52, 0.0  ;;  %v3327_v53 = vpack.c.bf16 %v2963_v46, %v2962_v45  ;;  %v2541_v46 = vld [vmem:[%s3848_s16 + $0x30] sm:$0xff] }
 0x7fa   : > { %1661 = vadd.xlane.f32.xlu0 %v1660_v54  ;;  %v2949_v54 = vld [vmem:[%s4206_s9 + $0x48] sm:$0xff] }
 0x80a   : > { %1708 = vperm.xlu1 %3474, %v1705_v56   ;;  %v2966_v56 = vld [vmem:[%s4206_s9 + $0xa0] sm:$0xff] }
 0x886   : > { %v1665_v57 = vpop.xlane.xlu1 %1664 }
 0x887   : > { %v1668_v58 = vmul.f32 0.03125, %v1665_v57  ;;  %v1662_v10 = vpop.xlane.xlu0 %1661  ;;  %v2967_v57 = vld [vmem:[%s4206_s9 + $0xa8] sm:$0xff] }
 0x888   : > { %v1667_v8 = vmul.f32 0.03125, %v1662_v10  ;;  %v3307_v10 = vpack.c.bf16 %v2949_v54, %v2948_v49 }
 0x889   : > { %v1670_v59 = vsub.f32 %v1657_v51, %v1668_v58 }
 0x88a   : > { %v1669_v60 = vsub.f32 %v1656_v52, %v1667_v8  ;;  %v4014_v37 = vpop.permute.xlu1 %1708  ;;  %v3303_v52 = vpack.c.bf16 %v1724_v44, %v1723_v43  ;;  %v3331_v8 = vpack.c.bf16 %v2967_v57, %v2966_v56  ;;  %v2539_v43 = vld [vmem:[%s3848_s16 + $0x20] sm:$0xff]  ;;  %v2540_v44 = vld [vmem:[%s3848_s16 + $0x28] sm:$0xff] }
 0x88b   : > { %v1672_v61 = vmul.f32 %v1670_v59, %v1670_v59  ;;  %vm1713_vm14 = vcmp.eq.s32.totalorder %v4014_v37, 1  ;;  %v3371_v45 = vpack.c.bf16 %v2540_v44, %v2539_v43 }
 0x88c   : > { %v1671_v63 = vmul.f32 %v1669_v60, %v1669_v60 }
 0x88d   : > { %v1676_v62 = vsel %vm785_vm2, %v1672_v61, 0.0  ;;  %v2968_v61 = vld [vmem:[%s4206_s9 + $0xb0] sm:$0xff] }
 0x88e   : > { %1677 = vadd.xlane.f32.xlu0 %v1676_v62  ;;  %v1673_v0 = vsel %vm785_vm2, %v1671_v63, 0.0  ;;  %v2969_v62 = vld [vmem:[%s4206_s9 + $0xb8] sm:$0xff] }
 0x892   : > { %1674 = vadd.xlane.f32.xlu0 %v1673_v0 }
 0x8a8   : > { %1711 = vperm.xlu0 %3475, %v1706_v2   ;;  %v3335_v2 = vpack.c.bf16 %v2969_v62, %v2968_v61 }
 0x91b   : > { %v1678_v25 = vpop.xlane.xlu0 %1677 }
 0x91c   : > { %v1680_v26 = vmul.f32 0.03125, %v1678_v25  ;;  %v2984_v25 = vld [vmem:[%s4206_s9 + $0x100] sm:$0xff] }
 0x91e   : > { %v1682_v16 = vadd.f32 1e-05, %v1680_v26  ;;  %v2985_v26 = vld [vmem:[%s4206_s9 + $0x108] sm:$0xff] }
 0x91f   : > { %v1675_v27 = vpop.xlane.xlu0 %1674 }
 0x920   : > { %3492 = vrsqrt.f32 %v1682_v16  ;;  %v1679_v28 = vmul.f32 0.03125, %v1675_v27  ;;  %v3355_v27 = vpack.c.bf16 %v2985_v26, %v2984_v25 }
 0x922   : > { %v1681_v29 = vadd.f32 1e-05, %v1679_v28  ;;  %v2986_v28 = vld [vmem:[%s4206_s9 + $0x110] sm:$0xff] }
 0x924   : > { %3494 = vrsqrt.f32 %v1681_v29  ;;  %v2987_v29 = vld [vmem:[%s4206_s9 + $0x118] sm:$0xff] }
 0x927   : > { %v4006_v33 = vpop.permute.xlu0 %1711 }
 0x928   : > { %vm1714_vm13 = vcmp.eq.s32.totalorder %v4006_v33, 1 }
 0x92a   : > { %v3493_v30 = vpop.eup %3492 }
 0x92b   : > { %v1686_v32 = vmul.f32 %v3493_v30, %v1670_v59  ;;  %v2950_v59 = vld [vmem:[%s4206_s9 + $0x50] sm:$0xff]  ;;  %v3359_v30 = vpack.c.bf16 %v2987_v29, %v2986_v28 }
 0x92d   : > { %v1694_v35 = vmul.f32 %v2938_v31, %v1686_v32 }
 0x92e   : > { %v3495_v15 = vpop.eup %3494 }
 0x92f   : > { %v1702_v36 = vadd.f32 %v2939_v34, %v1694_v35  ;;  %v1685_v38 = vmul.f32 %v3495_v15, %v1669_v60  ;;  %v2951_v60 = vld [vmem:[%s4206_s9 + $0x58] sm:$0xff]  ;;  %v2535_v35 = vld [vmem:[%s3848_s16] sm:$0xff]  ;;  %v2536_v15 = vld [vmem:[%s3848_s16 + $0x8] sm:$0xff] }
 0x930   : > { %v3311_v0 = vpack.c.bf16 %v2951_v60, %v2950_v59 }
 0x931   : > { %v4018_v39 = vsel %vm1714_vm13, 0.0, %v1702_v36  ;;  %v1693_v40 = vmul.f32 %v2938_v31, %v1685_v38  ;;  %v2537_v36 = vld [vmem:[%s3848_s16 + $0x10] sm:$0xff]  ;;  %v3363_v38 = vpack.c.bf16 %v2536_v15, %v2535_v35 }
 0x932   : > { %1718 = vst.msk [vmem:[#allocation3 + $0x14] sm:$0xff] %vm785_vm2, %v4018_v39 }
 0x933   : > { %v1701_v41 = vadd.f32 %v2939_v34, %v1693_v40  ;;  %v2538_v40 = vld [vmem:[%s3848_s16 + $0x18] sm:$0xff] }
 0x935   : > { %v4025_v42 = vsel %vm1713_vm14, 0.0, %v1701_v41  ;;  %v3367_v41 = vpack.c.bf16 %v2538_v40, %v2537_v36 }
 0x936   : > { %1717 = vst.msk [vmem:[#allocation3 + $0x4] sm:$0xff] %vm785_vm2, %v4025_v42 }
 0x939   : > { %v1726_v50 = vld [vmem:[#allocation3 + $0x11] sm:$0xff] }
 0x93a   : > { %v1985_v51 = vld [vmem:[#allocation3 + $0x13] sm:$0xff] }
 0x93b   : > { %v1720_v63 = vld [vmem:[#allocation3 + $0x10] sm:$0xff]  ;;  %v2435_v34 = vld [vmem:[#allocation3 + $0x18] sm:$0xff] }
 0x93c   : > { %v2075_v1 = vld [vmem:[#allocation3 + $0x14] sm:$0xff] }
 0x93d   : > { %v1725_v47 = vld [vmem:[#allocation3 + $0x1] sm:$0xff]  ;;  %v1895_v12 = vld [vmem:[#allocation3 + $0x12] sm:$0xff] }
 0x93e   : > { %v1984_v48 = vld [vmem:[#allocation3 + $0x3] sm:$0xff]  ;;  %3165 = vmatprep.mubr.msk.f32.mxu0 %vm785_vm2, %v1725_v47  ;;  %v2165_v14 = vld [vmem:[#allocation3 + $0x15] sm:$0xff] }
 0x93f   : > { %3198 = vmatprep.mubr.msk.f32.mxu1 %vm785_vm2, %v1984_v48  ;;  %3166 = vmatmul.mubr.msk.f32.vlgmr.msra.gmra.mrb[10].mxu0 %vm785_vm2, %v1726_v50  ;;  %v1719_v55 = vld [vmem:[#allocation3] sm:$0xff]  ;;  %v2345_v31 = vld [vmem:[#allocation3 + $0x17] sm:$0xff]  ;;  %v2434_v32 = vld [vmem:[#allocation3 + $0x8] sm:$0xff] }
 0x940   : > { %3199 = vmatmul.mubr.msk.f32.vlgmr.msra.gmra.mrb[10].mxu1 %vm785_vm2, %v1985_v51  ;;  %3302 = vmatpush3.bf16.msra.mxu0 %v3299_v22  ;;  %v2074_v58 = vld [vmem:[#allocation3 + $0x4] sm:$0xff] }
 0x941   : > { %3176 = vmatprep.mubr.msk.f32.mxu0 %vm785_vm2, %v1719_v55  ;;  %3326 = vmatpush3.bf16.msra.mxu1 %v3323_v24  ;;  %v1894_v5 = vld [vmem:[#allocation3 + $0x2] sm:$0xff]  ;;  %v2255_v24 = vld [vmem:[#allocation3 + $0x16] sm:$0xff] }
 0x942   : > { %3209 = vmatprep.mubr.msk.f32.mxu1 %vm785_vm2, %v2074_v58  ;;  %3304 = vmatprep.subr.bf16.mxu0 %v3303_v52  ;;  %v2164_v6 = vld [vmem:[#allocation3 + $0x5] sm:$0xff] }
 0x943   : > { %3328 = vmatprep.subr.bf16.mxu1 %v3327_v53  ;;  %v2254_v19 = vld [vmem:[#allocation3 + $0x6] sm:$0xff] }
 0x944   : > { %3306 = vmatpush3.bf16.msra.mxu0 %v3303_v52  ;;  %v2981_v22 = vld [vmem:[%s4206_s9 + $0xf8] sm:$0xff]  ;;  %v2990_v52 = vld [vmem:[%s738_s26] ss:$0 sm:$0xff]  ;;  %s4209_s26 = sld [smem:[#allocation13_spill]] }
 0x945   : > { %3330 = vmatpush3.bf16.msra.mxu1 %v3327_v53  ;;  %3308 = vmatprep.subr.bf16.mxu0 %v3307_v10  ;;  %v3351_v23 = vpack.c.bf16 %v2981_v22, %v2980_v21  ;;  %v2344_v16 = vld [vmem:[#allocation3 + $0x7] sm:$0xff]  ;;  %v2994_v22 = vld [vmem:[%s749_s23] ss:$0 sm:$0xff] }
 0x946   : > { %3332 = vmatprep.subr.bf16.mxu1 %v3331_v8  ;;  %v2542_v47 = vld [vmem:[%s3848_s16 + $0x38] sm:$0xff] }
 0x947   : > { %3177 = vmatmul.mubr.msk.f32.vlgmr.msra.gmra.mrb[10].mxu0 %vm785_vm2, %v1720_v63  ;;  %v3375_v48 = vpack.c.bf16 %v2542_v47, %v2541_v46 }
 0x948   : > { %3210 = vmatmul.mubr.msk.f32.vlgmr.msra.gmra.mrb[10].mxu1 %vm785_vm2, %v2075_v1  ;;  %3310 = vmatpush3.bf16.msra.mxu0 %v3307_v10 }
 0x949   : > { %3187 = vmatprep.mubr.msk.f32.mxu0 %vm785_vm2, %v1894_v5  ;;  %3334 = vmatpush3.bf16.msra.mxu1 %v3331_v8  ;;  %v2991_v8 = vld [vmem:[%s746_s29] ss:$0 sm:$0xff] }
 0x94a   : > { %3220 = vmatprep.mubr.msk.f32.mxu1 %vm785_vm2, %v2164_v6  ;;  %3312 = vmatprep.subr.bf16.mxu0 %v3311_v0  ;;  %s4210_s23 = sadd.s32 4294967295, %s4209_s26  }
 0x94b   : > { %3336 = vmatprep.subr.bf16.mxu1 %v3335_v2  ;;  %p4110_p9 = scmp.eq.s32.totalorder %s4210_s23, 1 }
 0x94c   : > { %3314 = vmatpush3.bf16.msra.mxu0 %v3311_v0 }
 0x94d   : > { %3338 = vmatpush3.bf16.msra.mxu1 %v3335_v2  ;;  %3364 = vmatprep.subr.bf16.mxu0 %v3363_v38  ;;  %p3532_p6 = pnand %p3531_p5, %p4110_p9 }
 0x94e   : > { %3340 = vmatprep.subr.bf16.mxu1 %v3339_v7 }
 0x94f   : > { %3188 = vmatmul.mubr.msk.f32.vlgmr.msra.gmra.mrb[10].mxu0 %vm785_vm2, %v1895_v12  ;;  %p3533_p8 = pneg %p3532_p6 }
 0x950   : > { %3221 = vmatmul.mubr.msk.f32.vlgmr.msra.gmra.mrb[10].mxu1 %vm785_vm2, %v2165_v14  ;;  %3366 = vmatpush3.bf16.msra.mxu0 %v3363_v38 }
 0x951   : > { %3342 = vmatpush3.bf16.msra.mxu1 %v3339_v7  ;;  %3231 = vmatprep.mubr.msk.f32.mxu1 %vm785_vm2, %v2254_v19  ;;  %p3540_p1 = pnand %p3539_p0, %p3533_p8 }
 0x952   : > { %3344 = vmatprep.subr.bf16.mxu1 %v3343_v13  ;;  %3368 = vmatprep.subr.bf16.mxu0 %v3367_v41 }
 0x954   : > { %3370 = vmatpush3.bf16.msra.mxu0 %v3367_v41 }
 0x955   : > { %3346 = vmatpush3.bf16.msra.mxu1 %v3343_v13  ;;  %3372 = vmatprep.subr.bf16.mxu0 %v3371_v45 }
 0x956   : > { %3348 = vmatprep.subr.bf16.mxu1 %v3347_v20 }
 0x958   : > { %3232 = vmatmul.mubr.msk.f32.vlgmr.msra.gmra.mrb[10].mxu1 %vm785_vm2, %v2255_v24  ;;  %3374 = vmatpush3.bf16.msra.mxu0 %v3371_v45  ;;  %v2995_v24 = vld [vmem:[%s752_s27] ss:$0 sm:$0xff] }
 0x959   : > { %3350 = vmatpush3.bf16.msra.mxu1 %v3347_v20  ;;  %3242 = vmatprep.mubr.msk.f32.mxu1 %vm785_vm2, %v2344_v16 }
 0x95a   : > { %3352 = vmatprep.subr.bf16.mxu1 %v3351_v23  ;;  %3376 = vmatprep.subr.bf16.mxu0 %v3375_v48 }
 0x95c   : > { %3378 = vmatpush3.bf16.msra.mxu0 %v3375_v48 }
 0x95d   : > { %3354 = vmatpush3.bf16.msra.mxu1 %v3351_v23 }
 0x95e   : > { %3356 = vmatprep.subr.bf16.mxu1 %v3355_v27 }
 0x960   : > { %3243 = vmatmul.mubr.msk.f32.vlgmr.msra.gmra.mrb[10].mxu1 %vm785_vm2, %v2345_v31 }
 0x961   : > { %3358 = vmatpush3.bf16.msra.mxu1 %v3355_v27  ;;  %3253 = vmatprep.mubr.msk.f32.mxu1 %vm785_vm2, %v2434_v32 }
 0x962   : > { %3360 = vmatprep.subr.bf16.mxu1 %v3359_v30 }
 0x965   : > { %3362 = vmatpush3.bf16.msra.mxu1 %v3359_v30 }
 0x968   : > { %3254 = vmatmul.mubr.msk.f32.vlgmr.msra.gmra.mrb[10].mxu1 %vm785_vm2, %v2435_v34 }
 0xa22   : > { %v3189_v49 = vpop.f32.mrb[10].mxu0 }
 0xa23   : > { %v1973_v50 = vpop.f32.mrb[11].mxu0 }
 0xa3b   : > { %v3255_v51 = vpop.f32.mrb[10].mxu1 }
 0xa3c   : > { %v3379_v53 = vadd.f32 %v3255_v51, %v3189_v49  ;;  %v2513_v54 = vpop.f32.mrb[11].mxu1 }
 0xa3d   : > { %v3380_v55 = vadd.f32 %v2513_v54, %v1973_v50 }
 0xa3e   : > { %v2532_v56 = vadd.f32 %v3379_v53, %v2990_v52 }
 0xa3f   : > { %v2531_v57 = vadd.f32 %v3380_v55, %v2990_v52 }
 0xa40   : > { %v2534_v10 = vmax.f32 %v2532_v56, 0.0 }
 0xa41   : > { %v2533_v58 = vmax.f32 %v2531_v57, 0.0 }
 0xa43   : > { %3272 = vmatprep.mubr.msk.f32.mxu0 %vm2550_vm15, %v2533_v58 }
 0xa44   : > { %3273 = vmatmul.mubr.msk.f32.vlgmr.msra.gmra.mrb[12].mxu0 %vm2550_vm15, %v2534_v10 }
 0xb17   : > { %v3274_v59 = vpop.f32.mrb[12].mxu0 }
 0xb18   : > { %v2629_v60 = vadd.f32 %v3274_v59, %v2991_v8  ;;  %v2623_v61 = vpop.f32.mrb[13].mxu0 }
 0xb19   : > { %v2624_v62 = vadd.f32 %v2991_v8, %v2623_v61 }
 0xb1a   : > { %v2633_v63 = vadd.f32 %v2629_v60, %v4018_v39 }
 0xb1b   : > { %v2632_v0 = vadd.f32 %v2624_v62, %v4025_v42 }
 0xb1c   : > { %v2639_v1 = vsel %vm785_vm2, %v2633_v63, 0.0 }
 0xb1d   : > { %2640 = vadd.xlane.f32.xlu0 %v2639_v1  ;;  %v2636_v2 = vsel %vm785_vm2, %v2632_v0, 0.0 }
 0xb1e   : > { %2637 = vadd.xlane.f32.xlu1 %v2636_v2 }
 0xbaa   : > { %v2641_v3 = vpop.xlane.xlu0 %2640 }
 0xbab   : > { %v2643_v4 = vmul.f32 0.03125, %v2641_v3  ;;  %v2638_v5 = vpop.xlane.xlu1 %2637 }
 0xbac   : > { %v2642_v6 = vmul.f32 0.03125, %v2638_v5 }
 0xbad   : > { %v2645_v7 = vsub.f32 %v2633_v63, %v2643_v4 }
 0xbae   : > { %v2644_v9 = vsub.f32 %v2632_v0, %v2642_v6 }
 0xbaf   : > { %v2647_v39 = vmul.f32 %v2645_v7, %v2645_v7 }
 0xbb0   : > { %v2646_v11 = vmul.f32 %v2644_v9, %v2644_v9 }
 0xbb1   : > { %v2651_v42 = vsel %vm785_vm2, %v2647_v39, 0.0 }
 0xbb2   : > { %v2648_v12 = vsel %vm785_vm2, %v2646_v11, 0.0 }
 0xbb3   : > { %2649 = vadd.xlane.f32.xlu1 %v2648_v12 }
 0xbb7   : > { %2652 = vadd.xlane.f32.xlu1 %v2651_v42 }
 0xc40   : > { %v2650_v13 = vpop.xlane.xlu1 %2649 }
 0xc41   : > { %v2654_v14 = vmul.f32 0.03125, %v2650_v13 }
 0xc43   : > { %v2656_v17 = vadd.f32 1e-05, %v2654_v14 }
 0xc44   : > { %v2653_v18 = vpop.xlane.xlu1 %2652 }
 0xc45   : > { %3496 = vrsqrt.f32 %v2656_v17  ;;  %v2655_v19 = vmul.f32 0.03125, %v2653_v18 }
 0xc47   : > { %v2657_v20 = vadd.f32 1e-05, %v2655_v19 }
 0xc49   : > { %3498 = vrsqrt.f32 %v2657_v20 }
 0xc4f   : > { %v3497_v21 = vpop.eup %3496 }
 0xc50   : > { %v2660_v23 = vmul.f32 %v3497_v21, %v2644_v9 }
 0xc52   : > { %v2668_v25 = vmul.f32 %v2994_v22, %v2660_v23 }
 0xc53   : > { %v3499_v26 = vpop.eup %3498 }
 0xc54   : > { %v2661_v16 = vmul.f32 %v3499_v26, %v2645_v7  ;;  %v2676_v27 = vadd.f32 %v2995_v24, %v2668_v25 }
 0xc56   : > { %v2669_v28 = vmul.f32 %v2994_v22, %v2661_v16  ;;  %v2678_v29 = vsel %vm1713_vm14, 0.0, %v2676_v27 }
 0xc57   : > { %2680 = vst.msk [vmem:[#allocation7] sm:$0xff] %vm785_vm2, %v2678_v29 }
 0xc58   : > { %v2677_v30 = vadd.f32 %v2995_v24, %v2669_v28 }
 0xc5a   : > { %v2679_v31 = vsel %vm1714_vm13, 0.0, %v2677_v30 }
 0xc5b   : > { %2681 = vst.msk [vmem:[#allocation7 + $0x8] sm:$0xff] %vm785_vm2, %v2679_v31 }
 0xc5c   : > { %3543 = shalt.err (!%p3540_p1)
}
 0xc5d   : > { %s4212_s3 = sld [smem:[#allocation22_spill]] }
 0xc63   : > { %s3544_s21 = scalar_lea.hbm %s4212_s3, 256 }
 0xc64   : > { %p3545_p2 = scmp.ne.s32.totalorder %s4212_s3, %s3544_s21  ;;  %p3550_p3 = scmp.lt.u32.totalorder %s3544_s21, %s4212_s3 }
 0xc66   : > { %p3546_p11 = pnand %p3545_p2, %p4110_p9 }
 0xc68   : > { %p3547_p13 = pneg %p3546_p11 }
 0xc6a   : > { %p3552_p4 = pnand %p3550_p3, %p3547_p13 }
 0xc6c   : > { %3555 = shalt.err (!%p3552_p4)
}
 0xc6d   : > { %s3626_s15 = smov 128   ;;  %s3627_s26 = smov 8  }
 0xc6e   : > { %3401 = dma.vmem_to_hbm [thread:$0]  (%p4110_p9), %s2692_s17, 256, %s4212_s3, [#allocation6], %s3626_s15, %s3626_s15, %s3627_s26  }
 0xc6f   : > { %3585 = dma.done.wait (%p4110_p9), [#allocation6], 256  }
 0xc70   : > { %3587 = vsyncadd (%p4110_p9), [#allocation6], 4294967040 }
 0xc71 PF: > { %s4213_s9 = sld [smem:[#allocation13_spill]]  ;;  %s4214_s18 = sld [smem:[#allocation10_spill]] }
 0xc72   : > { %s4215_s19 = sld [smem:[#allocation11_spill]]  ;;  %s4216_s20 = sld [smem:[#allocation15_spill]] }
 0xc73   : > { %s4217_s21 = sld [smem:[#allocation12_spill]]  ;;  %s4218_s22 = sld [smem:[#allocation14_spill]] }
 0xc77   : > { %s29_s23 = sadd.s32 1, %s4213_s9  }
 0xc78   : > { %p26_p7 = scmp.ge.s32.totalorder %s29_s23, 4  }
 0xc7a   :  { %28 = sbr.rel (!%p26_p7) target bundleno = 12 (0xc), region = 172 }
 0xc81   :  { %2707 = vsyncpa [#allocation5], 1 }
 0xc82   :  { %2709 = vsyncpa [#allocation5 + $0x1], 1 }
 0xc83   :  { %2710 = vsyncpa [#allocation6], 1 }
 0xc84   :  { %2712 = vsyncpa [#allocation6 + $0x1], 1 }

</bundles_post_ra>
